<compile_context>
chip_gen: v5e
topology: v5e:2x2
jax: 0.10.0
libtpu: 0.0.40
codegen_flags: <defaults>
</compile_context>

<pallas_src>
import functools

import jax
import jax.numpy as jnp
from jax import lax
from jax.experimental import pallas as pl
from jax.experimental.pallas import tpu as pltpu

_UNROLL_THRESHOLD = 16   # steps; above this use fori_loop(unroll=8)


def _round_up(x, m):
    return (x + m - 1) // m * m


def _pick_t_chunk(S, B):
    """Chunk-length heuristic.

    Tiny problems: a single chunk (no pipelining needed).  Long sequences: aim
    for >= ~8 chunks so the x fetch / out writeback of adjacent chunks pipeline
    behind the recurrence, with (t_chunk * B) sublane-divisible so the flat
    (S*B, D) x block is legal when there is more than one chunk.
    NOTE: re-derive the cap against v7x's 64 MiB VMEM for very large H.
    """
    if S * B <= 1024:
        return S
    target = max(8, min(S // 8, 256))
    for tc in range(target, S):
        if S % tc == 0 and (tc * B) % 8 == 0:
            return tc
    return S


def _gru_chunk_kernel(x_ref, h0_ref, wih_ref, whh_ref, gib_ref, bhn_ref,
                      out_ref, hn_ref, gi_scratch, h_scratch,
                      *, t_chunk, batch, hidden, h_pad, unroll_threshold):
    """One grid step == one chunk of `t_chunk` GRU time steps.

    x_ref     : (t_chunk*batch, D)        chunk inputs (native dtype, no pad)
    h0_ref    : (batch, h_pad)            initial hidden state, f32, lane-padded
    wih_ref   : (D, 3*h_pad)              gate-blocked W_ih^T  [r | z | n]
    whh_ref   : (h_pad, 3*h_pad)          gate-blocked W_hh^T  [r | z | n]
    gib_ref   : (1, 3*h_pad)              folded biases (b_i{r,z,n} + b_h{r,z})
    bhn_ref   : (1, h_pad)                b_hn (stays inside r*(.) per GRU)
    out_ref   : (t_chunk, batch, hidden)  chunk outputs, native (un-padded)
    hn_ref    : (batch, hidden) f32       final hidden state (resident output)
    gi_scratch: (t_chunk*batch, 3*h_pad)  staged input projection (f32)
    h_scratch : (batch, h_pad) f32        hidden carry persisting across chunks
    """
    c = pl.program_id(0)

    @pl.when(c == 0)
    def _():
        h_scratch[...] = h0_ref[...]

    w_dt = whh_ref.dtype

    # Hoisted non-recurrent projection: one MXU matmul per chunk, staged into
    # VMEM scratch (never held live as a value across the recurrence).
    gi_scratch[...] = (
        jnp.dot(x_ref[...].astype(w_dt), wih_ref[...],
                preferred_element_type=jnp.float32)
        + gib_ref[...])

    # Split W_hh so r/z sigmoids (EUP) overlap the n-gate matmul (MXU).
    w_hh = whh_ref[...]
    w_rz = w_hh[:, :2 * h_pad]
    w_n = w_hh[:, 2 * h_pad:]
    # Hoisted once per chunk (JAX does not CSE broadcasts inside the loop).
    b_hn = jnp.broadcast_to(bhn_ref[...], (batch, h_pad))

    h_prev = h_scratch[...]                 # f32 carry
    h_cast = h_prev.astype(w_dt)            # matmul-operand copy, pre-cast

    def step(t, h, h_c):
        row = t * batch
        if (batch % 8 == 0) and not isinstance(t, int):
            row = pl.multiple_of(row, 8)
        gi = gi_scratch[pl.ds(row, batch), :]              # (batch, 3*h_pad)
        i_r = gi[:, :h_pad]
        i_z = gi[:, h_pad:2 * h_pad]
        i_n = gi[:, 2 * h_pad:]
        # Only the two matmuls below are on the sequential critical path.
        gh_rz = jnp.dot(h_c, w_rz, preferred_element_type=jnp.float32)
        gh_n = jnp.dot(h_c, w_n, preferred_element_type=jnp.float32)
        r = jax.nn.sigmoid(i_r + gh_rz[:, :h_pad])
        z = jax.nn.sigmoid(i_z + gh_rz[:, h_pad:])
        n = jnp.tanh(i_n + r * (gh_n + b_hn))
        h_new = (1.0 - z) * n + z * h
        out_ref[t] = h_new[:, :hidden].astype(out_ref.dtype)
        # Produce next step's matmul operand here (cast off the chain head).
        return h_new, h_new.astype(w_dt)

    if t_chunk <= unroll_threshold:
        h, h_c = h_prev, h_cast
        for t in range(t_chunk):                  # static offsets, full unroll
            h, h_c = step(t, h, h_c)
    else:
        def body(t, carry):
            return step(t, *carry)
        h, h_c = lax.fori_loop(0, t_chunk, body, (h_prev, h_cast), unroll=8)

    h_scratch[...] = h
    # Final hidden from the f32 carry (exact regardless of out_ref dtype).
    hn_ref[...] = h[:, :hidden]


@functools.partial(jax.jit,
                   static_argnames=("t_chunk", "compute_dtype", "out_dtype"))
def encoder_rnn_forward(x, init_hidden, w_ih, w_hh, b_ih, b_hh, *,
                        t_chunk=None, compute_dtype=jnp.float32,
                        out_dtype=None):
    """Pallas GRU forward (torch.nn.GRU semantics, gate order r, z, n).

    x           : (S, B, D)   float32
    init_hidden : (1, B, H)   float32
    w_ih        : (3H, D)     PyTorch layout
    w_hh        : (3H, H)
    b_ih, b_hh  : (3H,)
    returns (output (S, B, H), h_n (1, B, H))
    """
    S, B, D = x.shape
    H = init_hidden.shape[-1]
    H_pad = _round_up(H, 128)
    if out_dtype is None:
        out_dtype = x.dtype
    cdt = jnp.dtype(compute_dtype)

    if t_chunk is None:
        t_chunk = _pick_t_chunk(S, B)
    # TODO(synk): ragged sequence lengths need a tail chunk or S-padding.
    assert S % t_chunk == 0
    assert t_chunk == S or (t_chunk * B) % 8 == 0
    num_chunks = S // t_chunk

    # --- wrapper-side packing (tiny, grid-invariant operands only) -----------
    def pack_w(w, rows):
        # PyTorch (3H, in) -> transposed, gate-blocked, lane-padded (rows, 3*H_pad)
        wt = jnp.transpose(w).astype(cdt)                 # (in, 3H)
        out = jnp.zeros((rows, 3 * H_pad), cdt)
        for g in range(3):
            out = out.at[:w.shape[1], g * H_pad:g * H_pad + H].set(
                wt[:, g * H:(g + 1) * H])
        return out

    wih_p = pack_w(w_ih, D)       # (D, 3*H_pad): contraction dim stays native
    whh_p = pack_w(w_hh, H_pad)   # (H_pad, 3*H_pad): rows H..H_pad are zero

    b_ih32 = b_ih.astype(jnp.float32)
    b_hh32 = b_hh.astype(jnp.float32)
    gi_b = jnp.zeros((1, 3 * H_pad), jnp.float32)
    gi_b = gi_b.at[0, :H].set(b_ih32[:H] + b_hh32[:H])                            # r
    gi_b = gi_b.at[0, H_pad:H_pad + H].set(b_ih32[H:2 * H] + b_hh32[H:2 * H])     # z
    gi_b = gi_b.at[0, 2 * H_pad:2 * H_pad + H].set(b_ih32[2 * H:])                # n (input part)
    b_hn = jnp.zeros((1, H_pad), jnp.float32).at[0, :H].set(b_hh32[2 * H:])

    h0 = jnp.zeros((B, H_pad), jnp.float32).at[:, :H].set(
        init_hidden[0].astype(jnp.float32))

    # x stays un-padded in HBM: free row-major view, cast happens in-kernel.
    x2d = x.reshape(S * B, D)

    # --- specs ----------------------------------------------------------------
    c_item = cdt.itemsize

    def inv_spec(shape, itemsize):
        idx = lambda c, _rank=len(shape): (0,) * _rank
        nbytes = itemsize
        for d in shape:
            nbytes *= d
        if nbytes >= (4 << 20):
            # Grid-invariant and large: fetch once, single-buffered (halves the
            # VMEM residency of big weights -- matters for v7x's 64 MiB VMEM).
            return pl.BlockSpec(shape, idx, pipeline_mode=pl.Buffered(1))
        return pl.BlockSpec(shape, idx)

    def padded_bytes(shape, itemsize):
        s = list(shape)
        if len(s) >= 2:
            s[-1] = _round_up(s[-1], 128)
            s[-2] = _round_up(s[-2], 8)
        n = itemsize
        for d in s:
            n *= d
        return n

    vmem_est = (
        2 * padded_bytes((t_chunk * B, D), x.dtype.itemsize)        # x block
        + 2 * padded_bytes((t_chunk, B, H), jnp.dtype(out_dtype).itemsize)
        + 2 * padded_bytes((B, H), 4)                               # h_n block
        + 2 * padded_bytes((B, H_pad), 4)                           # h0
        + 2 * padded_bytes((D, 3 * H_pad), c_item)                  # W_ih^T
        + 2 * padded_bytes((H_pad, 3 * H_pad), c_item)              # W_hh^T
        + padded_bytes((t_chunk * B, 3 * H_pad), 4)                 # gi scratch
        + padded_bytes((B, H_pad), 4)                               # h scratch
        + (1 << 20))
    vmem_limit = None
    if vmem_est > (24 << 20):
        # Raise the scoped limit only when needed (v7x: re-derive t_chunk for
        # the 64 MiB physical VMEM rather than relying on this ceiling).
        vmem_limit = int(min(vmem_est * 5 // 4, 96 << 20))

    grid_spec = pltpu.PrefetchScalarGridSpec(
        num_scalar_prefetch=0,
        grid=(num_chunks,),
        in_specs=[
            pl.BlockSpec((t_chunk * B, D), lambda c: (c, 0)),     # x chunk (no pad)
            inv_spec((B, H_pad), 4),                              # h0
            inv_spec((D, 3 * H_pad), c_item),                     # W_ih^T
            inv_spec((H_pad, 3 * H_pad), c_item),                 # W_hh^T
            inv_spec((1, 3 * H_pad), 4),                          # folded biases
            inv_spec((1, H_pad), 4),                              # b_hn
        ],
        out_specs=[
            pl.BlockSpec((t_chunk, B, H), lambda c: (c, 0, 0)),   # output (native)
            pl.BlockSpec((B, H), lambda c: (0, 0)),               # final hidden
        ],
        scratch_shapes=[
            pltpu.VMEM((t_chunk * B, 3 * H_pad), jnp.float32),    # staged gi
            pltpu.VMEM((B, H_pad), jnp.float32),                  # hidden carry
        ],
    )

    out, h_last = pl.pallas_call(
        functools.partial(_gru_chunk_kernel, t_chunk=t_chunk, batch=B,
                          hidden=H, h_pad=H_pad,
                          unroll_threshold=_UNROLL_THRESHOLD),
        out_shape=(jax.ShapeDtypeStruct((S, B, H), out_dtype),
                   jax.ShapeDtypeStruct((B, H), jnp.float32)),
        grid_spec=grid_spec,
        compiler_params=pltpu.CompilerParams(
            dimension_semantics=("arbitrary",),    # sequential recurrence
            vmem_limit_bytes=vmem_limit,
        ),
    )(x2d, h0, wih_p, whh_p, gi_b, b_hn)

    return out, h_last[None]


def gru_reference(x, init_hidden, w_ih, w_hh, b_ih, b_hh):
    """Pure-JAX reference of torch.nn.GRU (1 layer, unidirectional)."""
    H = init_hidden.shape[-1]

    def step(h, xt):
        gi = xt @ w_ih.T + b_ih
        gh = h @ w_hh.T + b_hh
        i_r, i_z, i_n = gi[:, :H], gi[:, H:2 * H], gi[:, 2 * H:]
        h_r, h_z, h_n = gh[:, :H], gh[:, H:2 * H], gh[:, 2 * H:]
        r = jax.nn.sigmoid(i_r + h_r)
        z = jax.nn.sigmoid(i_z + h_z)
        n = jnp.tanh(i_n + r * h_n)
        h_new = (1.0 - z) * n + z * h
        return h_new, h_new

    h_last, outs = lax.scan(step, init_hidden[0], x)
    return outs, h_last[None]


if __name__ == "__main__":
    # EncoderRNN(input_size=16, hidden_size=32), defaults n_layer=1, unidirectional.
    seq_len, batch, input_size, hidden_size = 8, 2, 16, 32

    key = jax.random.PRNGKey(0)
    kx, kih, khh, kbi, kbh = jax.random.split(key, 5)

    bound = 1.0 / (hidden_size ** 0.5)
    w_ih = jax.random.uniform(kih, (3 * hidden_size, input_size),
                              jnp.float32, -bound, bound)
    w_hh = jax.random.uniform(khh, (3 * hidden_size, hidden_size),
                              jnp.float32, -bound, bound)
    b_ih = jax.random.uniform(kbi, (3 * hidden_size,), jnp.float32, -bound, bound)
    b_hh = jax.random.uniform(kbh, (3 * hidden_size,), jnp.float32, -bound, bound)

    x = jax.random.normal(kx, (seq_len, batch, input_size), jnp.float32)
    init_hidden = jnp.zeros((1, batch, hidden_size), jnp.float32)  # initHidden(batch)

    ref_out, ref_hn = gru_reference(x, init_hidden, w_ih, w_hh, b_ih, b_hh)

    # f32 path: PyTorch-equivalent semantics.
    out, h_n = encoder_rnn_forward(x, init_hidden, w_ih, w_hh, b_ih, b_hh)
    out, h_n = jax.block_until_ready((out, h_n))
    assert out.shape == (seq_len, batch, hidden_size)
    assert h_n.shape == (1, batch, hidden_size)
    assert jnp.allclose(out, ref_out, atol=2e-5, rtol=2e-5)
    assert jnp.allclose(h_n, ref_hn, atol=2e-5, rtol=2e-5)

    # bf16 matmul-operand variant (f32 accumulation / gate math) — helps every
    # TPU generation including v5e (bf16-native MXU); declared perf variant.
    out_bf, hn_bf = encoder_rnn_forward(x, init_hidden, w_ih, w_hh, b_ih, b_hh,
                                        compute_dtype=jnp.bfloat16)
    out_bf, hn_bf = jax.block_until_ready((out_bf, hn_bf))
    assert out_bf.shape == (seq_len, batch, hidden_size)
    assert jnp.allclose(out_bf, ref_out, atol=1e-1)
    assert jnp.allclose(hn_bf, ref_hn, atol=1e-1)

    print("KERNEL_OK")
</pallas_src>

<mosaic_0001>
module attributes {stable_mosaic.version = 11 : i64} {
  func.func @_gru_chunk_kernel(%arg0: i32, %arg1: memref<16x16xf32, #tpu.memory_space<vmem>>, %arg2: memref<2x128xf32, #tpu.memory_space<vmem>>, %arg3: memref<16x384xf32, #tpu.memory_space<vmem>>, %arg4: memref<128x384xf32, #tpu.memory_space<vmem>>, %arg5: memref<1x384xf32, #tpu.memory_space<vmem>>, %arg6: memref<1x128xf32, #tpu.memory_space<vmem>>, %arg7: memref<8x2x32xf32, #tpu.memory_space<vmem>>, %arg8: memref<2x32xf32, #tpu.memory_space<vmem>>, %arg9: memref<16x384xf32, #tpu.memory_space<vmem>>, %arg10: memref<2x128xf32, #tpu.memory_space<vmem>>) attributes {dimension_semantics = [#tpu.dimension_semantics<arbitrary>], iteration_bounds = array<i64: 1>, scalar_prefetch = 0 : i64, scratch_operands = 2 : i64, tpu.core_type = #tpu.core_type<tc>, window_params = [{transform_indices = @transform_0, window_bounds = array<i64: 16, 16>}, {pipeline_mode = #tpu.pipeline_mode<synchronous>, transform_indices = @transform_1, window_bounds = array<i64: 2, 128>}, {pipeline_mode = #tpu.pipeline_mode<synchronous>, transform_indices = @transform_2, window_bounds = array<i64: 16, 384>}, {pipeline_mode = #tpu.pipeline_mode<synchronous>, transform_indices = @transform_3, window_bounds = array<i64: 128, 384>}, {pipeline_mode = #tpu.pipeline_mode<synchronous>, transform_indices = @transform_4, window_bounds = array<i64: 1, 384>}, {pipeline_mode = #tpu.pipeline_mode<synchronous>, transform_indices = @transform_5, window_bounds = array<i64: 1, 128>}, {transform_indices = @transform_6, window_bounds = array<i64: 8, 2, 32>}, {pipeline_mode = #tpu.pipeline_mode<synchronous>, transform_indices = @transform_7, window_bounds = array<i64: 2, 32>}]} {
    %c0_i32 = arith.constant 0 : i32
    %0 = arith.cmpi eq, %arg0, %c0_i32 : i32
    %1 = arith.extui %0 : i1 to i32
    %c0_i32_0 = arith.constant 0 : i32
    %2 = arith.cmpi ne, %1, %c0_i32_0 : i32
    scf.if %2 {
      %c0_87 = arith.constant 0 : index
      %c0_88 = arith.constant 0 : index
      %284 = vector.load %arg2[%c0_87, %c0_88] : memref<2x128xf32, #tpu.memory_space<vmem>>, vector<2x128xf32>
      %c0_89 = arith.constant 0 : index
      %c0_90 = arith.constant 0 : index
      %285 = vector.load %arg10[%c0_89, %c0_90] : memref<2x128xf32, #tpu.memory_space<vmem>>, vector<2x128xf32>
      tpu.vector_store %arg10[%c0_89, %c0_90], %284 {strides = array<i32>} : memref<2x128xf32, #tpu.memory_space<vmem>>, vector<2x128xf32>,
    } else {
    }
    %c0 = arith.constant 0 : index
    %c0_1 = arith.constant 0 : index
    %3 = vector.load %arg1[%c0, %c0_1] : memref<16x16xf32, #tpu.memory_space<vmem>>, vector<16x16xf32>
    %c0_2 = arith.constant 0 : index
    %c0_3 = arith.constant 0 : index
    %4 = vector.load %arg3[%c0_2, %c0_3] : memref<16x384xf32, #tpu.memory_space<vmem>>, vector<16x384xf32>
    %cst = arith.constant dense<0.000000e+00> : vector<16x384xf32>
    %5 = tpu.matmul %3, %4, %cst {dimension_numbers = #tpu.dot_dimension_numbers<[1], [0], [0], [1], [0, 0, 1, 1], [], []>} : vector<16x16xf32>, vector<16x384xf32>, vector<16x384xf32> -> vector<16x384xf32>
    %c0_4 = arith.constant 0 : index
    %c0_5 = arith.constant 0 : index
    %6 = vector.load %arg5[%c0_4, %c0_5] : memref<1x384xf32, #tpu.memory_space<vmem>>, vector<1x384xf32>
    %7 = vector.broadcast %6 : vector<1x384xf32> to vector<16x384xf32>
    %8 = arith.addf %5, %7 : vector<16x384xf32>
    %c0_6 = arith.constant 0 : index
    %c0_7 = arith.constant 0 : index
    %9 = vector.load %arg9[%c0_6, %c0_7] : memref<16x384xf32, #tpu.memory_space<vmem>>, vector<16x384xf32>
    tpu.vector_store %arg9[%c0_6, %c0_7], %8 {strides = array<i32>} : memref<16x384xf32, #tpu.memory_space<vmem>>, vector<16x384xf32>,
    %c0_8 = arith.constant 0 : index
    %c0_9 = arith.constant 0 : index
    %10 = vector.load %arg4[%c0_8, %c0_9] : memref<128x384xf32, #tpu.memory_space<vmem>>, vector<128x384xf32>
    %11 = vector.extract_strided_slice %10 {offsets = [0, 0], sizes = [128, 256], strides = [1, 1]} : vector<128x384xf32> to vector<128x256xf32>
    %12 = vector.extract_strided_slice %10 {offsets = [0, 256], sizes = [128, 128], strides = [1, 1]} : vector<128x384xf32> to vector<128x128xf32>
    %c0_10 = arith.constant 0 : index
    %c0_11 = arith.constant 0 : index
    %13 = vector.load %arg6[%c0_10, %c0_11] : memref<1x128xf32, #tpu.memory_space<vmem>>, vector<1x128xf32>
    %14 = vector.shape_cast %13 : vector<1x128xf32> to vector<1x128xf32>
    %15 = vector.broadcast %14 : vector<1x128xf32> to vector<2x128xf32>
    %c0_12 = arith.constant 0 : index
    %c0_13 = arith.constant 0 : index
    %16 = vector.load %arg10[%c0_12, %c0_13] : memref<2x128xf32, #tpu.memory_space<vmem>>, vector<2x128xf32>
    %c0_14 = arith.constant 0 : index
    %c0_15 = arith.constant 0 : index
    %17 = vector.load %arg9[%c0_14, %c0_15] : memref<16x384xf32, #tpu.memory_space<vmem>>, vector<2x384xf32>
    %18 = vector.extract_strided_slice %17 {offsets = [0, 0], sizes = [2, 128], strides = [1, 1]} : vector<2x384xf32> to vector<2x128xf32>
    %19 = vector.extract_strided_slice %17 {offsets = [0, 128], sizes = [2, 128], strides = [1, 1]} : vector<2x384xf32> to vector<2x128xf32>
    %20 = vector.extract_strided_slice %17 {offsets = [0, 256], sizes = [2, 128], strides = [1, 1]} : vector<2x384xf32> to vector<2x128xf32>
    %cst_16 = arith.constant dense<0.000000e+00> : vector<2x256xf32>
    %21 = tpu.matmul %16, %11, %cst_16 {dimension_numbers = #tpu.dot_dimension_numbers<[1], [0], [0], [1], [0, 0, 1, 1], [], []>} : vector<2x128xf32>, vector<128x256xf32>, vector<2x256xf32> -> vector<2x256xf32>
    %cst_17 = arith.constant dense<0.000000e+00> : vector<2x128xf32>
    %22 = tpu.matmul %16, %12, %cst_17 {dimension_numbers = #tpu.dot_dimension_numbers<[1], [0], [0], [1], [0, 0, 1, 1], [], []>} : vector<2x128xf32>, vector<128x128xf32>, vector<2x128xf32> -> vector<2x128xf32>
    %23 = vector.extract_strided_slice %21 {offsets = [0, 0], sizes = [2, 128], strides = [1, 1]} : vector<2x256xf32> to vector<2x128xf32>
    %24 = arith.addf %18, %23 : vector<2x128xf32>
    %25 = arith.negf %24 : vector<2x128xf32>
    %26 = math.exp %25 : vector<2x128xf32>
    %cst_18 = arith.constant 1.000000e+00 : f32
    %27 = vector.broadcast %cst_18 : f32 to vector<2x128xf32>
    %28 = arith.addf %27, %26 : vector<2x128xf32>
    %29 = arith.divf %27, %28 : vector<2x128xf32>
    %30 = vector.extract_strided_slice %21 {offsets = [0, 128], sizes = [2, 128], strides = [1, 1]} : vector<2x256xf32> to vector<2x128xf32>
    %31 = arith.addf %19, %30 : vector<2x128xf32>
    %32 = arith.negf %31 : vector<2x128xf32>
    %33 = math.exp %32 : vector<2x128xf32>
    %cst_19 = arith.constant 1.000000e+00 : f32
    %34 = vector.broadcast %cst_19 : f32 to vector<2x128xf32>
    %35 = arith.addf %34, %33 : vector<2x128xf32>
    %36 = arith.divf %34, %35 : vector<2x128xf32>
    %37 = arith.addf %22, %15 : vector<2x128xf32>
    %38 = arith.mulf %29, %37 : vector<2x128xf32>
    %39 = arith.addf %20, %38 : vector<2x128xf32>
    %40 = math.tanh %39 : vector<2x128xf32>
    %cst_20 = arith.constant 1.000000e+00 : f32
    %41 = vector.broadcast %cst_20 : f32 to vector<2x128xf32>
    %42 = arith.subf %41, %36 : vector<2x128xf32>
    %43 = arith.mulf %42, %40 : vector<2x128xf32>
    %44 = arith.mulf %36, %16 : vector<2x128xf32>
    %45 = arith.addf %43, %44 : vector<2x128xf32>
    %46 = vector.extract_strided_slice %45 {offsets = [0, 0], sizes = [2, 32], strides = [1, 1]} : vector<2x128xf32> to vector<2x32xf32>
    %c0_21 = arith.constant 0 : index
    %c0_22 = arith.constant 0 : index
    %c0_23 = arith.constant 0 : index
    %47 = vector.load %arg7[%c0_21, %c0_22, %c0_23] : memref<8x2x32xf32, #tpu.memory_space<vmem>>, vector<1x2x32xf32>
    %48 = vector.shape_cast %47 : vector<1x2x32xf32> to vector<2x32xf32>
    %49 = vector.shape_cast %46 : vector<2x32xf32> to vector<1x2x32xf32>
    tpu.vector_store %arg7[%c0_21, %c0_22, %c0_23], %49 {strides = array<i32>} : memref<8x2x32xf32, #tpu.memory_space<vmem>>, vector<1x2x32xf32>,
    %c2 = arith.constant 2 : index
    %c0_24 = arith.constant 0 : index
    %50 = vector.load %arg9[%c2, %c0_24] : memref<16x384xf32, #tpu.memory_space<vmem>>, vector<2x384xf32>
    %51 = vector.extract_strided_slice %50 {offsets = [0, 0], sizes = [2, 128], strides = [1, 1]} : vector<2x384xf32> to vector<2x128xf32>
    %52 = vector.extract_strided_slice %50 {offsets = [0, 128], sizes = [2, 128], strides = [1, 1]} : vector<2x384xf32> to vector<2x128xf32>
    %53 = vector.extract_strided_slice %50 {offsets = [0, 256], sizes = [2, 128], strides = [1, 1]} : vector<2x384xf32> to vector<2x128xf32>
    %cst_25 = arith.constant dense<0.000000e+00> : vector<2x256xf32>
    %54 = tpu.matmul %45, %11, %cst_25 {dimension_numbers = #tpu.dot_dimension_numbers<[1], [0], [0], [1], [0, 0, 1, 1], [], []>} : vector<2x128xf32>, vector<128x256xf32>, vector<2x256xf32> -> vector<2x256xf32>
    %cst_26 = arith.constant dense<0.000000e+00> : vector<2x128xf32>
    %55 = tpu.matmul %45, %12, %cst_26 {dimension_numbers = #tpu.dot_dimension_numbers<[1], [0], [0], [1], [0, 0, 1, 1], [], []>} : vector<2x128xf32>, vector<128x128xf32>, vector<2x128xf32> -> vector<2x128xf32>
    %56 = vector.extract_strided_slice %54 {offsets = [0, 0], sizes = [2, 128], strides = [1, 1]} : vector<2x256xf32> to vector<2x128xf32>
    %57 = arith.addf %51, %56 : vector<2x128xf32>
    %58 = arith.negf %57 : vector<2x128xf32>
    %59 = math.exp %58 : vector<2x128xf32>
    %cst_27 = arith.constant 1.000000e+00 : f32
    %60 = vector.broadcast %cst_27 : f32 to vector<2x128xf32>
    %61 = arith.addf %60, %59 : vector<2x128xf32>
    %62 = arith.divf %60, %61 : vector<2x128xf32>
    %63 = vector.extract_strided_slice %54 {offsets = [0, 128], sizes = [2, 128], strides = [1, 1]} : vector<2x256xf32> to vector<2x128xf32>
    %64 = arith.addf %52, %63 : vector<2x128xf32>
    %65 = arith.negf %64 : vector<2x128xf32>
    %66 = math.exp %65 : vector<2x128xf32>
    %cst_28 = arith.constant 1.000000e+00 : f32
    %67 = vector.broadcast %cst_28 : f32 to vector<2x128xf32>
    %68 = arith.addf %67, %66 : vector<2x128xf32>
    %69 = arith.divf %67, %68 : vector<2x128xf32>
    %70 = arith.addf %55, %15 : vector<2x128xf32>
    %71 = arith.mulf %62, %70 : vector<2x128xf32>
    %72 = arith.addf %53, %71 : vector<2x128xf32>
    %73 = math.tanh %72 : vector<2x128xf32>
    %cst_29 = arith.constant 1.000000e+00 : f32
    %74 = vector.broadcast %cst_29 : f32 to vector<2x128xf32>
    %75 = arith.subf %74, %69 : vector<2x128xf32>
    %76 = arith.mulf %75, %73 : vector<2x128xf32>
    %77 = arith.mulf %69, %45 : vector<2x128xf32>
    %78 = arith.addf %76, %77 : vector<2x128xf32>
    %79 = vector.extract_strided_slice %78 {offsets = [0, 0], sizes = [2, 32], strides = [1, 1]} : vector<2x128xf32> to vector<2x32xf32>
    %c1 = arith.constant 1 : index
    %c0_30 = arith.constant 0 : index
    %c0_31 = arith.constant 0 : index
    %80 = vector.load %arg7[%c1, %c0_30, %c0_31] : memref<8x2x32xf32, #tpu.memory_space<vmem>>, vector<1x2x32xf32>
    %81 = vector.shape_cast %80 : vector<1x2x32xf32> to vector<2x32xf32>
    %82 = vector.shape_cast %79 : vector<2x32xf32> to vector<1x2x32xf32>
    tpu.vector_store %arg7[%c1, %c0_30, %c0_31], %82 {strides = array<i32>} : memref<8x2x32xf32, #tpu.memory_space<vmem>>, vector<1x2x32xf32>,
    %c4 = arith.constant 4 : index
    %c0_32 = arith.constant 0 : index
    %83 = vector.load %arg9[%c4, %c0_32] : memref<16x384xf32, #tpu.memory_space<vmem>>, vector<2x384xf32>
    %84 = vector.extract_strided_slice %83 {offsets = [0, 0], sizes = [2, 128], strides = [1, 1]} : vector<2x384xf32> to vector<2x128xf32>
    %85 = vector.extract_strided_slice %83 {offsets = [0, 128], sizes = [2, 128], strides = [1, 1]} : vector<2x384xf32> to vector<2x128xf32>
    %86 = vector.extract_strided_slice %83 {offsets = [0, 256], sizes = [2, 128], strides = [1, 1]} : vector<2x384xf32> to vector<2x128xf32>
    %cst_33 = arith.constant dense<0.000000e+00> : vector<2x256xf32>
    %87 = tpu.matmul %78, %11, %cst_33 {dimension_numbers = #tpu.dot_dimension_numbers<[1], [0], [0], [1], [0, 0, 1, 1], [], []>} : vector<2x128xf32>, vector<128x256xf32>, vector<2x256xf32> -> vector<2x256xf32>
    %cst_34 = arith.constant dense<0.000000e+00> : vector<2x128xf32>
    %88 = tpu.matmul %78, %12, %cst_34 {dimension_numbers = #tpu.dot_dimension_numbers<[1], [0], [0], [1], [0, 0, 1, 1], [], []>} : vector<2x128xf32>, vector<128x128xf32>, vector<2x128xf32> -> vector<2x128xf32>
    %89 = vector.extract_strided_slice %87 {offsets = [0, 0], sizes = [2, 128], strides = [1, 1]} : vector<2x256xf32> to vector<2x128xf32>
    %90 = arith.addf %84, %89 : vector<2x128xf32>
    %91 = arith.negf %90 : vector<2x128xf32>
    %92 = math.exp %91 : vector<2x128xf32>
    %cst_35 = arith.constant 1.000000e+00 : f32
    %93 = vector.broadcast %cst_35 : f32 to vector<2x128xf32>
    %94 = arith.addf %93, %92 : vector<2x128xf32>
    %95 = arith.divf %93, %94 : vector<2x128xf32>
    %96 = vector.extract_strided_slice %87 {offsets = [0, 128], sizes = [2, 128], strides = [1, 1]} : vector<2x256xf32> to vector<2x128xf32>
    %97 = arith.addf %85, %96 : vector<2x128xf32>
    %98 = arith.negf %97 : vector<2x128xf32>
    %99 = math.exp %98 : vector<2x128xf32>
    %cst_36 = arith.constant 1.000000e+00 : f32
    %100 = vector.broadcast %cst_36 : f32 to vector<2x128xf32>
    %101 = arith.addf %100, %99 : vector<2x128xf32>
    %102 = arith.divf %100, %101 : vector<2x128xf32>
    %103 = arith.addf %88, %15 : vector<2x128xf32>
    %104 = arith.mulf %95, %103 : vector<2x128xf32>
    %105 = arith.addf %86, %104 : vector<2x128xf32>
    %106 = math.tanh %105 : vector<2x128xf32>
    %cst_37 = arith.constant 1.000000e+00 : f32
    %107 = vector.broadcast %cst_37 : f32 to vector<2x128xf32>
    %108 = arith.subf %107, %102 : vector<2x128xf32>
    %109 = arith.mulf %108, %106 : vector<2x128xf32>
    %110 = arith.mulf %102, %78 : vector<2x128xf32>
    %111 = arith.addf %109, %110 : vector<2x128xf32>
    %112 = vector.extract_strided_slice %111 {offsets = [0, 0], sizes = [2, 32], strides = [1, 1]} : vector<2x128xf32> to vector<2x32xf32>
    %c2_38 = arith.constant 2 : index
    %c0_39 = arith.constant 0 : index
    %c0_40 = arith.constant 0 : index
    %113 = vector.load %arg7[%c2_38, %c0_39, %c0_40] : memref<8x2x32xf32, #tpu.memory_space<vmem>>, vector<1x2x32xf32>
    %114 = vector.shape_cast %113 : vector<1x2x32xf32> to vector<2x32xf32>
    %115 = vector.shape_cast %112 : vector<2x32xf32> to vector<1x2x32xf32>
    tpu.vector_store %arg7[%c2_38, %c0_39, %c0_40], %115 {strides = array<i32>} : memref<8x2x32xf32, #tpu.memory_space<vmem>>, vector<1x2x32xf32>,
    %c6 = arith.constant 6 : index
    %c0_41 = arith.constant 0 : index
    %116 = vector.load %arg9[%c6, %c0_41] : memref<16x384xf32, #tpu.memory_space<vmem>>, vector<2x384xf32>
    %117 = vector.extract_strided_slice %116 {offsets = [0, 0], sizes = [2, 128], strides = [1, 1]} : vector<2x384xf32> to vector<2x128xf32>
    %118 = vector.extract_strided_slice %116 {offsets = [0, 128], sizes = [2, 128], strides = [1, 1]} : vector<2x384xf32> to vector<2x128xf32>
    %119 = vector.extract_strided_slice %116 {offsets = [0, 256], sizes = [2, 128], strides = [1, 1]} : vector<2x384xf32> to vector<2x128xf32>
    %cst_42 = arith.constant dense<0.000000e+00> : vector<2x256xf32>
    %120 = tpu.matmul %111, %11, %cst_42 {dimension_numbers = #tpu.dot_dimension_numbers<[1], [0], [0], [1], [0, 0, 1, 1], [], []>} : vector<2x128xf32>, vector<128x256xf32>, vector<2x256xf32> -> vector<2x256xf32>
    %cst_43 = arith.constant dense<0.000000e+00> : vector<2x128xf32>
    %121 = tpu.matmul %111, %12, %cst_43 {dimension_numbers = #tpu.dot_dimension_numbers<[1], [0], [0], [1], [0, 0, 1, 1], [], []>} : vector<2x128xf32>, vector<128x128xf32>, vector<2x128xf32> -> vector<2x128xf32>
    %122 = vector.extract_strided_slice %120 {offsets = [0, 0], sizes = [2, 128], strides = [1, 1]} : vector<2x256xf32> to vector<2x128xf32>
    %123 = arith.addf %117, %122 : vector<2x128xf32>
    %124 = arith.negf %123 : vector<2x128xf32>
    %125 = math.exp %124 : vector<2x128xf32>
    %cst_44 = arith.constant 1.000000e+00 : f32
    %126 = vector.broadcast %cst_44 : f32 to vector<2x128xf32>
    %127 = arith.addf %126, %125 : vector<2x128xf32>
    %128 = arith.divf %126, %127 : vector<2x128xf32>
    %129 = vector.extract_strided_slice %120 {offsets = [0, 128], sizes = [2, 128], strides = [1, 1]} : vector<2x256xf32> to vector<2x128xf32>
    %130 = arith.addf %118, %129 : vector<2x128xf32>
    %131 = arith.negf %130 : vector<2x128xf32>
    %132 = math.exp %131 : vector<2x128xf32>
    %cst_45 = arith.constant 1.000000e+00 : f32
    %133 = vector.broadcast %cst_45 : f32 to vector<2x128xf32>
    %134 = arith.addf %133, %132 : vector<2x128xf32>
    %135 = arith.divf %133, %134 : vector<2x128xf32>
    %136 = arith.addf %121, %15 : vector<2x128xf32>
    %137 = arith.mulf %128, %136 : vector<2x128xf32>
    %138 = arith.addf %119, %137 : vector<2x128xf32>
    %139 = math.tanh %138 : vector<2x128xf32>
    %cst_46 = arith.constant 1.000000e+00 : f32
    %140 = vector.broadcast %cst_46 : f32 to vector<2x128xf32>
    %141 = arith.subf %140, %135 : vector<2x128xf32>
    %142 = arith.mulf %141, %139 : vector<2x128xf32>
    %143 = arith.mulf %135, %111 : vector<2x128xf32>
    %144 = arith.addf %142, %143 : vector<2x128xf32>
    %145 = vector.extract_strided_slice %144 {offsets = [0, 0], sizes = [2, 32], strides = [1, 1]} : vector<2x128xf32> to vector<2x32xf32>
    %c3 = arith.constant 3 : index
    %c0_47 = arith.constant 0 : index
    %c0_48 = arith.constant 0 : index
    %146 = vector.load %arg7[%c3, %c0_47, %c0_48] : memref<8x2x32xf32, #tpu.memory_space<vmem>>, vector<1x2x32xf32>
    %147 = vector.shape_cast %146 : vector<1x2x32xf32> to vector<2x32xf32>
    %148 = vector.shape_cast %145 : vector<2x32xf32> to vector<1x2x32xf32>
    tpu.vector_store %arg7[%c3, %c0_47, %c0_48], %148 {strides = array<i32>} : memref<8x2x32xf32, #tpu.memory_space<vmem>>, vector<1x2x32xf32>,
    %c8 = arith.constant 8 : index
    %c0_49 = arith.constant 0 : index
    %149 = vector.load %arg9[%c8, %c0_49] : memref<16x384xf32, #tpu.memory_space<vmem>>, vector<2x384xf32>
    %150 = vector.extract_strided_slice %149 {offsets = [0, 0], sizes = [2, 128], strides = [1, 1]} : vector<2x384xf32> to vector<2x128xf32>
    %151 = vector.extract_strided_slice %149 {offsets = [0, 128], sizes = [2, 128], strides = [1, 1]} : vector<2x384xf32> to vector<2x128xf32>
    %152 = vector.extract_strided_slice %149 {offsets = [0, 256], sizes = [2, 128], strides = [1, 1]} : vector<2x384xf32> to vector<2x128xf32>
    %cst_50 = arith.constant dense<0.000000e+00> : vector<2x256xf32>
    %153 = tpu.matmul %144, %11, %cst_50 {dimension_numbers = #tpu.dot_dimension_numbers<[1], [0], [0], [1], [0, 0, 1, 1], [], []>} : vector<2x128xf32>, vector<128x256xf32>, vector<2x256xf32> -> vector<2x256xf32>
    %cst_51 = arith.constant dense<0.000000e+00> : vector<2x128xf32>
    %154 = tpu.matmul %144, %12, %cst_51 {dimension_numbers = #tpu.dot_dimension_numbers<[1], [0], [0], [1], [0, 0, 1, 1], [], []>} : vector<2x128xf32>, vector<128x128xf32>, vector<2x128xf32> -> vector<2x128xf32>
    %155 = vector.extract_strided_slice %153 {offsets = [0, 0], sizes = [2, 128], strides = [1, 1]} : vector<2x256xf32> to vector<2x128xf32>
    %156 = arith.addf %150, %155 : vector<2x128xf32>
    %157 = arith.negf %156 : vector<2x128xf32>
    %158 = math.exp %157 : vector<2x128xf32>
    %cst_52 = arith.constant 1.000000e+00 : f32
    %159 = vector.broadcast %cst_52 : f32 to vector<2x128xf32>
    %160 = arith.addf %159, %158 : vector<2x128xf32>
    %161 = arith.divf %159, %160 : vector<2x128xf32>
    %162 = vector.extract_strided_slice %153 {offsets = [0, 128], sizes = [2, 128], strides = [1, 1]} : vector<2x256xf32> to vector<2x128xf32>
    %163 = arith.addf %151, %162 : vector<2x128xf32>
    %164 = arith.negf %163 : vector<2x128xf32>
    %165 = math.exp %164 : vector<2x128xf32>
    %cst_53 = arith.constant 1.000000e+00 : f32
    %166 = vector.broadcast %cst_53 : f32 to vector<2x128xf32>
    %167 = arith.addf %166, %165 : vector<2x128xf32>
    %168 = arith.divf %166, %167 : vector<2x128xf32>
    %169 = arith.addf %154, %15 : vector<2x128xf32>
    %170 = arith.mulf %161, %169 : vector<2x128xf32>
    %171 = arith.addf %152, %170 : vector<2x128xf32>
    %172 = math.tanh %171 : vector<2x128xf32>
    %cst_54 = arith.constant 1.000000e+00 : f32
    %173 = vector.broadcast %cst_54 : f32 to vector<2x128xf32>
    %174 = arith.subf %173, %168 : vector<2x128xf32>
    %175 = arith.mulf %174, %172 : vector<2x128xf32>
    %176 = arith.mulf %168, %144 : vector<2x128xf32>
    %177 = arith.addf %175, %176 : vector<2x128xf32>
    %178 = vector.extract_strided_slice %177 {offsets = [0, 0], sizes = [2, 32], strides = [1, 1]} : vector<2x128xf32> to vector<2x32xf32>
    %c4_55 = arith.constant 4 : index
    %c0_56 = arith.constant 0 : index
    %c0_57 = arith.constant 0 : index
    %179 = vector.load %arg7[%c4_55, %c0_56, %c0_57] : memref<8x2x32xf32, #tpu.memory_space<vmem>>, vector<1x2x32xf32>
    %180 = vector.shape_cast %179 : vector<1x2x32xf32> to vector<2x32xf32>
    %181 = vector.shape_cast %178 : vector<2x32xf32> to vector<1x2x32xf32>
    tpu.vector_store %arg7[%c4_55, %c0_56, %c0_57], %181 {strides = array<i32>} : memref<8x2x32xf32, #tpu.memory_space<vmem>>, vector<1x2x32xf32>,
    %c10 = arith.constant 10 : index
    %c0_58 = arith.constant 0 : index
    %182 = vector.load %arg9[%c10, %c0_58] : memref<16x384xf32, #tpu.memory_space<vmem>>, vector<2x384xf32>
    %183 = vector.extract_strided_slice %182 {offsets = [0, 0], sizes = [2, 128], strides = [1, 1]} : vector<2x384xf32> to vector<2x128xf32>
    %184 = vector.extract_strided_slice %182 {offsets = [0, 128], sizes = [2, 128], strides = [1, 1]} : vector<2x384xf32> to vector<2x128xf32>
    %185 = vector.extract_strided_slice %182 {offsets = [0, 256], sizes = [2, 128], strides = [1, 1]} : vector<2x384xf32> to vector<2x128xf32>
    %cst_59 = arith.constant dense<0.000000e+00> : vector<2x256xf32>
    %186 = tpu.matmul %177, %11, %cst_59 {dimension_numbers = #tpu.dot_dimension_numbers<[1], [0], [0], [1], [0, 0, 1, 1], [], []>} : vector<2x128xf32>, vector<128x256xf32>, vector<2x256xf32> -> vector<2x256xf32>
    %cst_60 = arith.constant dense<0.000000e+00> : vector<2x128xf32>
    %187 = tpu.matmul %177, %12, %cst_60 {dimension_numbers = #tpu.dot_dimension_numbers<[1], [0], [0], [1], [0, 0, 1, 1], [], []>} : vector<2x128xf32>, vector<128x128xf32>, vector<2x128xf32> -> vector<2x128xf32>
    %188 = vector.extract_strided_slice %186 {offsets = [0, 0], sizes = [2, 128], strides = [1, 1]} : vector<2x256xf32> to vector<2x128xf32>
    %189 = arith.addf %183, %188 : vector<2x128xf32>
    %190 = arith.negf %189 : vector<2x128xf32>
    %191 = math.exp %190 : vector<2x128xf32>
    %cst_61 = arith.constant 1.000000e+00 : f32
    %192 = vector.broadcast %cst_61 : f32 to vector<2x128xf32>
    %193 = arith.addf %192, %191 : vector<2x128xf32>
    %194 = arith.divf %192, %193 : vector<2x128xf32>
    %195 = vector.extract_strided_slice %186 {offsets = [0, 128], sizes = [2, 128], strides = [1, 1]} : vector<2x256xf32> to vector<2x128xf32>
    %196 = arith.addf %184, %195 : vector<2x128xf32>
    %197 = arith.negf %196 : vector<2x128xf32>
    %198 = math.exp %197 : vector<2x128xf32>
    %cst_62 = arith.constant 1.000000e+00 : f32
    %199 = vector.broadcast %cst_62 : f32 to vector<2x128xf32>
    %200 = arith.addf %199, %198 : vector<2x128xf32>
    %201 = arith.divf %199, %200 : vector<2x128xf32>
    %202 = arith.addf %187, %15 : vector<2x128xf32>
    %203 = arith.mulf %194, %202 : vector<2x128xf32>
    %204 = arith.addf %185, %203 : vector<2x128xf32>
    %205 = math.tanh %204 : vector<2x128xf32>
    %cst_63 = arith.constant 1.000000e+00 : f32
    %206 = vector.broadcast %cst_63 : f32 to vector<2x128xf32>
    %207 = arith.subf %206, %201 : vector<2x128xf32>
    %208 = arith.mulf %207, %205 : vector<2x128xf32>
    %209 = arith.mulf %201, %177 : vector<2x128xf32>
    %210 = arith.addf %208, %209 : vector<2x128xf32>
    %211 = vector.extract_strided_slice %210 {offsets = [0, 0], sizes = [2, 32], strides = [1, 1]} : vector<2x128xf32> to vector<2x32xf32>
    %c5 = arith.constant 5 : index
    %c0_64 = arith.constant 0 : index
    %c0_65 = arith.constant 0 : index
    %212 = vector.load %arg7[%c5, %c0_64, %c0_65] : memref<8x2x32xf32, #tpu.memory_space<vmem>>, vector<1x2x32xf32>
    %213 = vector.shape_cast %212 : vector<1x2x32xf32> to vector<2x32xf32>
    %214 = vector.shape_cast %211 : vector<2x32xf32> to vector<1x2x32xf32>
    tpu.vector_store %arg7[%c5, %c0_64, %c0_65], %214 {strides = array<i32>} : memref<8x2x32xf32, #tpu.memory_space<vmem>>, vector<1x2x32xf32>,
    %c12 = arith.constant 12 : index
    %c0_66 = arith.constant 0 : index
    %215 = vector.load %arg9[%c12, %c0_66] : memref<16x384xf32, #tpu.memory_space<vmem>>, vector<2x384xf32>
    %216 = vector.extract_strided_slice %215 {offsets = [0, 0], sizes = [2, 128], strides = [1, 1]} : vector<2x384xf32> to vector<2x128xf32>
    %217 = vector.extract_strided_slice %215 {offsets = [0, 128], sizes = [2, 128], strides = [1, 1]} : vector<2x384xf32> to vector<2x128xf32>
    %218 = vector.extract_strided_slice %215 {offsets = [0, 256], sizes = [2, 128], strides = [1, 1]} : vector<2x384xf32> to vector<2x128xf32>
    %cst_67 = arith.constant dense<0.000000e+00> : vector<2x256xf32>
    %219 = tpu.matmul %210, %11, %cst_67 {dimension_numbers = #tpu.dot_dimension_numbers<[1], [0], [0], [1], [0, 0, 1, 1], [], []>} : vector<2x128xf32>, vector<128x256xf32>, vector<2x256xf32> -> vector<2x256xf32>
    %cst_68 = arith.constant dense<0.000000e+00> : vector<2x128xf32>
    %220 = tpu.matmul %210, %12, %cst_68 {dimension_numbers = #tpu.dot_dimension_numbers<[1], [0], [0], [1], [0, 0, 1, 1], [], []>} : vector<2x128xf32>, vector<128x128xf32>, vector<2x128xf32> -> vector<2x128xf32>
    %221 = vector.extract_strided_slice %219 {offsets = [0, 0], sizes = [2, 128], strides = [1, 1]} : vector<2x256xf32> to vector<2x128xf32>
    %222 = arith.addf %216, %221 : vector<2x128xf32>
    %223 = arith.negf %222 : vector<2x128xf32>
    %224 = math.exp %223 : vector<2x128xf32>
    %cst_69 = arith.constant 1.000000e+00 : f32
    %225 = vector.broadcast %cst_69 : f32 to vector<2x128xf32>
    %226 = arith.addf %225, %224 : vector<2x128xf32>
    %227 = arith.divf %225, %226 : vector<2x128xf32>
    %228 = vector.extract_strided_slice %219 {offsets = [0, 128], sizes = [2, 128], strides = [1, 1]} : vector<2x256xf32> to vector<2x128xf32>
    %229 = arith.addf %217, %228 : vector<2x128xf32>
    %230 = arith.negf %229 : vector<2x128xf32>
    %231 = math.exp %230 : vector<2x128xf32>
    %cst_70 = arith.constant 1.000000e+00 : f32
    %232 = vector.broadcast %cst_70 : f32 to vector<2x128xf32>
    %233 = arith.addf %232, %231 : vector<2x128xf32>
    %234 = arith.divf %232, %233 : vector<2x128xf32>
    %235 = arith.addf %220, %15 : vector<2x128xf32>
    %236 = arith.mulf %227, %235 : vector<2x128xf32>
    %237 = arith.addf %218, %236 : vector<2x128xf32>
    %238 = math.tanh %237 : vector<2x128xf32>
    %cst_71 = arith.constant 1.000000e+00 : f32
    %239 = vector.broadcast %cst_71 : f32 to vector<2x128xf32>
    %240 = arith.subf %239, %234 : vector<2x128xf32>
    %241 = arith.mulf %240, %238 : vector<2x128xf32>
    %242 = arith.mulf %234, %210 : vector<2x128xf32>
    %243 = arith.addf %241, %242 : vector<2x128xf32>
    %244 = vector.extract_strided_slice %243 {offsets = [0, 0], sizes = [2, 32], strides = [1, 1]} : vector<2x128xf32> to vector<2x32xf32>
    %c6_72 = arith.constant 6 : index
    %c0_73 = arith.constant 0 : index
    %c0_74 = arith.constant 0 : index
    %245 = vector.load %arg7[%c6_72, %c0_73, %c0_74] : memref<8x2x32xf32, #tpu.memory_space<vmem>>, vector<1x2x32xf32>
    %246 = vector.shape_cast %245 : vector<1x2x32xf32> to vector<2x32xf32>
    %247 = vector.shape_cast %244 : vector<2x32xf32> to vector<1x2x32xf32>
    tpu.vector_store %arg7[%c6_72, %c0_73, %c0_74], %247 {strides = array<i32>} : memref<8x2x32xf32, #tpu.memory_space<vmem>>, vector<1x2x32xf32>,
    %c14 = arith.constant 14 : index
    %c0_75 = arith.constant 0 : index
    %248 = vector.load %arg9[%c14, %c0_75] : memref<16x384xf32, #tpu.memory_space<vmem>>, vector<2x384xf32>
    %249 = vector.extract_strided_slice %248 {offsets = [0, 0], sizes = [2, 128], strides = [1, 1]} : vector<2x384xf32> to vector<2x128xf32>
    %250 = vector.extract_strided_slice %248 {offsets = [0, 128], sizes = [2, 128], strides = [1, 1]} : vector<2x384xf32> to vector<2x128xf32>
    %251 = vector.extract_strided_slice %248 {offsets = [0, 256], sizes = [2, 128], strides = [1, 1]} : vector<2x384xf32> to vector<2x128xf32>
    %cst_76 = arith.constant dense<0.000000e+00> : vector<2x256xf32>
    %252 = tpu.matmul %243, %11, %cst_76 {dimension_numbers = #tpu.dot_dimension_numbers<[1], [0], [0], [1], [0, 0, 1, 1], [], []>} : vector<2x128xf32>, vector<128x256xf32>, vector<2x256xf32> -> vector<2x256xf32>
    %cst_77 = arith.constant dense<0.000000e+00> : vector<2x128xf32>
    %253 = tpu.matmul %243, %12, %cst_77 {dimension_numbers = #tpu.dot_dimension_numbers<[1], [0], [0], [1], [0, 0, 1, 1], [], []>} : vector<2x128xf32>, vector<128x128xf32>, vector<2x128xf32> -> vector<2x128xf32>
    %254 = vector.extract_strided_slice %252 {offsets = [0, 0], sizes = [2, 128], strides = [1, 1]} : vector<2x256xf32> to vector<2x128xf32>
    %255 = arith.addf %249, %254 : vector<2x128xf32>
    %256 = arith.negf %255 : vector<2x128xf32>
    %257 = math.exp %256 : vector<2x128xf32>
    %cst_78 = arith.constant 1.000000e+00 : f32
    %258 = vector.broadcast %cst_78 : f32 to vector<2x128xf32>
    %259 = arith.addf %258, %257 : vector<2x128xf32>
    %260 = arith.divf %258, %259 : vector<2x128xf32>
    %261 = vector.extract_strided_slice %252 {offsets = [0, 128], sizes = [2, 128], strides = [1, 1]} : vector<2x256xf32> to vector<2x128xf32>
    %262 = arith.addf %250, %261 : vector<2x128xf32>
    %263 = arith.negf %262 : vector<2x128xf32>
    %264 = math.exp %263 : vector<2x128xf32>
    %cst_79 = arith.constant 1.000000e+00 : f32
    %265 = vector.broadcast %cst_79 : f32 to vector<2x128xf32>
    %266 = arith.addf %265, %264 : vector<2x128xf32>
    %267 = arith.divf %265, %266 : vector<2x128xf32>
    %268 = arith.addf %253, %15 : vector<2x128xf32>
    %269 = arith.mulf %260, %268 : vector<2x128xf32>
    %270 = arith.addf %251, %269 : vector<2x128xf32>
    %271 = math.tanh %270 : vector<2x128xf32>
    %cst_80 = arith.constant 1.000000e+00 : f32
    %272 = vector.broadcast %cst_80 : f32 to vector<2x128xf32>
    %273 = arith.subf %272, %267 : vector<2x128xf32>
    %274 = arith.mulf %273, %271 : vector<2x128xf32>
    %275 = arith.mulf %267, %243 : vector<2x128xf32>
    %276 = arith.addf %274, %275 : vector<2x128xf32>
    %277 = vector.extract_strided_slice %276 {offsets = [0, 0], sizes = [2, 32], strides = [1, 1]} : vector<2x128xf32> to vector<2x32xf32>
    %c7 = arith.constant 7 : index
    %c0_81 = arith.constant 0 : index
    %c0_82 = arith.constant 0 : index
    %278 = vector.load %arg7[%c7, %c0_81, %c0_82] : memref<8x2x32xf32, #tpu.memory_space<vmem>>, vector<1x2x32xf32>
    %279 = vector.shape_cast %278 : vector<1x2x32xf32> to vector<2x32xf32>
    %280 = vector.shape_cast %277 : vector<2x32xf32> to vector<1x2x32xf32>
    tpu.vector_store %arg7[%c7, %c0_81, %c0_82], %280 {strides = array<i32>} : memref<8x2x32xf32, #tpu.memory_space<vmem>>, vector<1x2x32xf32>,
    %c0_83 = arith.constant 0 : index
    %c0_84 = arith.constant 0 : index
    %281 = vector.load %arg10[%c0_83, %c0_84] : memref<2x128xf32, #tpu.memory_space<vmem>>, vector<2x128xf32>
    tpu.vector_store %arg10[%c0_83, %c0_84], %276 {strides = array<i32>} : memref<2x128xf32, #tpu.memory_space<vmem>>, vector<2x128xf32>,
    %282 = vector.extract_strided_slice %276 {offsets = [0, 0], sizes = [2, 32], strides = [1, 1]} : vector<2x128xf32> to vector<2x32xf32>
    %c0_85 = arith.constant 0 : index
    %c0_86 = arith.constant 0 : index
    %283 = vector.load %arg8[%c0_85, %c0_86] : memref<2x32xf32, #tpu.memory_space<vmem>>, vector<2x32xf32>
    tpu.vector_store %arg8[%c0_85, %c0_86], %282 {strides = array<i32>} : memref<2x32xf32, #tpu.memory_space<vmem>>, vector<2x32xf32>,
    return
  }
  func.func @transform_0(%arg0: i32) -> (i32, i32) {
    %c0_i32 = arith.constant 0 : i32
    %c0_i32_0 = arith.constant 0 : i32
    return %arg0, %c0_i32 : i32, i32
  }
  func.func @transform_1(%arg0: i32) -> (i32, i32) {
    %c0_i32 = arith.constant 0 : i32
    %c0_i32_0 = arith.constant 0 : i32
    %c0_i32_1 = arith.constant 0 : i32
    return %c0_i32, %c0_i32_0 : i32, i32
  }
  func.func @transform_2(%arg0: i32) -> (i32, i32) {
    %c0_i32 = arith.constant 0 : i32
    %c0_i32_0 = arith.constant 0 : i32
    %c0_i32_1 = arith.constant 0 : i32
    return %c0_i32, %c0_i32_0 : i32, i32
  }
  func.func @transform_3(%arg0: i32) -> (i32, i32) {
    %c0_i32 = arith.constant 0 : i32
    %c0_i32_0 = arith.constant 0 : i32
    %c0_i32_1 = arith.constant 0 : i32
    return %c0_i32, %c0_i32_0 : i32, i32
  }
  func.func @transform_4(%arg0: i32) -> (i32, i32) {
    %c0_i32 = arith.constant 0 : i32
    %c0_i32_0 = arith.constant 0 : i32
    %c0_i32_1 = arith.constant 0 : i32
    return %c0_i32, %c0_i32_0 : i32, i32
  }
  func.func @transform_5(%arg0: i32) -> (i32, i32) {
    %c0_i32 = arith.constant 0 : i32
    %c0_i32_0 = arith.constant 0 : i32
    %c0_i32_1 = arith.constant 0 : i32
    return %c0_i32, %c0_i32_0 : i32, i32
  }
  func.func @transform_6(%arg0: i32) -> (i32, i32, i32) {
    %c0_i32 = arith.constant 0 : i32
    %c0_i32_0 = arith.constant 0 : i32
    %c0_i32_1 = arith.constant 0 : i32
    return %arg0, %c0_i32, %c0_i32_0 : i32, i32, i32
  }
  func.func @transform_7(%arg0: i32) -> (i32, i32) {
    %c0_i32 = arith.constant 0 : i32
    %c0_i32_0 = arith.constant 0 : i32
    %c0_i32_1 = arith.constant 0 : i32
    return %c0_i32, %c0_i32_0 : i32, i32
  }
}

</mosaic_0001>

<bundles_post_ra>
// kernel: encoder_rnn_forward.1
= control target key start
LH: loop header
LB: loop body
LE: loop exit
PB: predicated region body
PF: predicated region fallthrough
CT: control target
= control target key end

     0   :  { %13 = vsyncpa [#allocation5], 0  ;;  %vm49_vm0 = vcmask 130048   ;;  %s2426_s0 = inlined_call_operand.vmem [shape: f32[16,16], index: 0, kind: input, shape index: {}]   ;;  %s2427_s1 = inlined_call_operand.vmem [shape: f32[2,128], index: 1, kind: input, shape index: {}]   ;;  %s2428_s2 = inlined_call_operand.vmem [shape: f32[16,384], index: 2, kind: input, shape index: {}]   ;;  %s2429_s3 = inlined_call_operand.vmem [shape: f32[128,384], index: 3, kind: input, shape index: {}]   ;;  %s2430_s4 = inlined_call_operand.vmem [shape: f32[1,384], index: 4, kind: input, shape index: {}]   ;;  %s2431_s5 = inlined_call_operand.vmem [shape: f32[1,128], index: 5, kind: input, shape index: {}]   ;;  %s2432_s6 = inlined_call_operand.hbm [shape: f32[8,2,32], index: 6, kind: output, shape index: {0}]   ;;  %s2433_s7 = inlined_call_operand.hbm [shape: f32[2,32], index: 7, kind: output, shape index: {1}]  }
   0x1   :  { %v38_v0 = vld [vmem:[%s2428_s2 + $0x18] sm:$0xff]  ;;  %v1460_v1 = vld [vmem:[%s2429_s3 + $0x168] sm:$0xff]  ;;  %v35_v2 = vld [vmem:[%s2428_s2] sm:$0xff] }
   0x2   :  { %70 = vmatpush.msra.mxu0 %v38_v0  ;;  %187 = vmatpush.msra.mxu3 %v1460_v1  ;;  %v1469_v3 = vld [vmem:[%s2429_s3 + $0x150] sm:$0xff]  ;;  %v1479_v5 = vld [vmem:[%s2429_s3 + $0x138] sm:$0xff]  ;;  %v1491_v7 = vld [vmem:[%s2429_s3 + $0x120] sm:$0xff] }
   0x3   :  { %v1474_v4 = vld [vmem:[%s2429_s3 + $0x170] sm:$0xff]  ;;  %v1485_v6 = vld [vmem:[%s2429_s3 + $0x158] sm:$0xff]  ;;  %v1497_v8 = vld [vmem:[%s2429_s3 + $0x140] sm:$0xff] }
   0x4   :  { %71 = vmatpush.msra.mxu0 %v35_v2  ;;  %188 = vmatpush.msra.mxu3 %v1469_v3  ;;  %v1503_v9 = vld [vmem:[%s2429_s3 + $0x108] sm:$0xff]  ;;  %v33_v10 = vld [vmem:[%s2426_s0] sm:$0xff]  ;;  %v1522_v13 = vld [vmem:[%s2429_s3 + $0xf0] sm:$0xff] }
   0x5   :  { %v1512_v11 = vld [vmem:[%s2429_s3 + $0x128] sm:$0xff]  ;;  %1202 = vmatmul.msk.f32.vlgmr.msra.gmra.mxu0 %vm49_vm0, %v33_v10  ;;  %v39_v12 = vld [vmem:[%s2428_s2 + $0x20] sm:$0xff]  ;;  %v1531_v15 = vld [vmem:[%s2429_s3 + $0x110] sm:$0xff] }
   0x6   :  { %207 = vmatpush.msrb.mxu0 %v1474_v4  ;;  %189 = vmatpush.msra.mxu3 %v1479_v5  ;;  %v36_v14 = vld [vmem:[%s2428_s2 + $0x8] sm:$0xff]  ;;  %v1537_v16 = vld [vmem:[%s2429_s3 + $0xd8] sm:$0xff]  ;;  %v1550_v18 = vld [vmem:[%s2429_s3 + $0xc0] sm:$0xff] }
   0x7   :  { %93 = vmatpush.msra.mxu1 %v39_v12  ;;  %v1543_v17 = vld [vmem:[%s2429_s3 + $0xf8] sm:$0xff]  ;;  %v1555_v19 = vld [vmem:[%s2426_s0 + $0x8] sm:$0xff]  ;;  %v31_v20 = vld [vmem:[%s2427_s1] sm:$0x3] }
   0x8   :  { %208 = vmatpush.msrb.mxu0 %v1485_v6  ;;  %190 = vmatpush.msra.mxu3 %v1491_v7  ;;  %v1564_v21 = vld [vmem:[%s2429_s3 + $0xe0] sm:$0xff]  ;;  %32 = vst [vmem:[#allocation3] sm:$0x3] %v31_v20  ;;  %v1569_v22 = vld [vmem:[%s2429_s3 + $0x178] sm:$0xff]  ;;  %v1580_v24 = vld [vmem:[%s2429_s3 + $0xa8] sm:$0xff] }
   0x9   :  { %94 = vmatpush.msra.mxu1 %v36_v14  ;;  %v1574_v23 = vld [vmem:[%s2429_s3 + $0x160] sm:$0xff]  ;;  %v1587_v25 = vld [vmem:[%s2429_s3 + $0xc8] sm:$0xff]  ;;  %v1603_v28 = vld [vmem:[%s2429_s3 + $0x90] sm:$0xff] }
   0xa   :  { %209 = vmatpush.msrb.mxu0 %v1497_v8  ;;  %191 = vmatpush.msra.mxu3 %v1503_v9  ;;  %v1594_v26 = vld [vmem:[%s2429_s3 + $0x148] sm:$0xff]  ;;  %v37_v29 = vld [vmem:[%s2428_s2 + $0x10] sm:$0xff]  ;;  %v1624_v32 = vld [vmem:[%s2429_s3 + $0x78] sm:$0xff] }
   0xb   :  { %1204 = vmatmul.msk.f32.vlgmr.msra.gmra.mxu1 %vm49_vm0, %v33_v10  ;;  %v40_v27 = vld [vmem:[%s2428_s2 + $0x28] sm:$0xff]  ;;  %v1613_v30 = vld [vmem:[%s2429_s3 + $0xb0] sm:$0xff]  ;;  %v1629_v33 = vld [vmem:[%s2429_s3 + $0x98] sm:$0xff] }
   0xc   :  { %210 = vmatpush.msrb.mxu0 %v1512_v11  ;;  %192 = vmatpush.msra.mxu3 %v1522_v13  ;;  %v1618_v31 = vld [vmem:[%s2429_s3 + $0x130] sm:$0xff]  ;;  %v1636_v34 = vld [vmem:[%s2429_s3 + $0x118] sm:$0xff] }
   0xd   :  { %267 = vmatpush.msrb.mxu1 %v1569_v22  ;;  %1203 = vmatmul.msk.f32.gmra.mxu0 %vm49_vm0, %v1555_v19 }
   0xe   :  { %211 = vmatpush.msrb.mxu0 %v1531_v15  ;;  %193 = vmatpush.msra.mxu3 %v1537_v16 }
   0xf   :  { %268 = vmatpush.msrb.mxu1 %v1574_v23  ;;  %116 = vmatpush.msra.mxu2 %v40_v27 }
  0x10   :  { %212 = vmatpush.msrb.mxu0 %v1543_v17  ;;  %194 = vmatpush.msra.mxu3 %v1550_v18 }
  0x11   :  { %269 = vmatpush.msrb.mxu1 %v1594_v26  ;;  %117 = vmatpush.msra.mxu2 %v37_v29 }
  0x12   :  { %213 = vmatpush.msrb.mxu0 %v1564_v21  ;;  %195 = vmatpush.msra.mxu3 %v1580_v24 }
  0x14   :  { %214 = vmatpush.msrb.mxu0 %v1587_v25  ;;  %196 = vmatpush.msra.mxu3 %v1603_v28 }
  0x15   :  { %14 = vsyncpa [#allocation7], 0  ;;  %v1642_v35 = vld [vmem:[%s2429_s3 + $0x60] sm:$0xff]  ;;  %270 = vmatpush.msrb.mxu1 %v1618_v31  ;;  %1206 = vmatmul.msk.f32.vlgmr.msra.gmra.mxu2 %vm49_vm0, %v33_v10  ;;  %v1661_v38 = vld [vmem:[%s2429_s3 + $0x48] sm:$0xff]  ;;  %vm294_vm9 = vcmask 254976   ;;  %s1174_s11 = sshll.u32 %s2432_s6, 4  ;;  %s1175_s11 = int_to_ptr.hbm [resolvable:$true] %s1174_s11 }
  0x16   :  { %215 = vmatpush.msrb.mxu0 %v1613_v30  ;;  %197 = vmatpush.msra.mxu3 %v1624_v32  ;;  %v1649_v36 = vld [vmem:[%s2429_s3 + $0x80] sm:$0xff]  ;;  %v1668_v39 = vld [vmem:[%s2429_s3 + $0x68] sm:$0xff]  ;;  %v1681_v41 = vld [vmem:[%s2429_s3 + $0x30] sm:$0xff]  ;;  %s1411_s12 = smov [#allocation6]   ;;  %s1188_s16 = sshll.u32 %s2433_s7, 4  ;;  %s1189_s16 = int_to_ptr.hbm [resolvable:$true] %s1188_s16 }
  0x17   :  { %v1654_v37 = vld [vmem:[%s2429_s3 + $0x100] sm:$0xff]  ;;  %271 = vmatpush.msrb.mxu1 %v1636_v34  ;;  %v1673_v40 = vld [vmem:[%s2429_s3 + $0xe8] sm:$0xff]  ;;  %2452 = vst [vmem:[#allocation10_spill] sm:$0xff] %v1681_v41  ;;  %v1688_v42 = vld [vmem:[%s2429_s3 + $0x50] sm:$0xff]  ;;  %299 = vmatpush.msrb.mxu2 %v1460_v1  ;;  %s1186_s13 = sshll.u32 %s1411_s12, 4  ;;  %s1412_s6 = smov 32   ;;  %s1187_s13 = int_to_ptr.vmem [resolvable:$true] %s1186_s13 }
  0x18   :  { %216 = vmatpush.msrb.mxu0 %v1629_v33  ;;  %198 = vmatpush.msra.mxu3 %v1642_v35  ;;  %v1693_v43 = vld [vmem:[%s2429_s3 + $0xd0] sm:$0xff]  ;;  %v1700_v44 = vld [vmem:[%s2429_s3 + $0x18] sm:$0xff]  ;;  %v1719_v47 = vld [vmem:[%s2429_s3] sm:$0xff] }
  0x19   :  { %1205 = vmatmul.msk.f32.gmra.mxu1 %vm49_vm0, %v1555_v19  ;;  %2453 = vst [vmem:[#allocation11_spill] sm:$0xff] %v1700_v44  ;;  %v1707_v45 = vld [vmem:[%s2429_s3 + $0x38] sm:$0xff]  ;;  %300 = vmatpush.msrb.mxu2 %v1469_v3  ;;  %v1723_v48 = vld [vmem:[#allocation3] sm:$0x3]  ;;  %v1728_v49 = vld [vmem:[%s2429_s3 + $0x20] sm:$0xff] }
  0x1a   :  { %217 = vmatpush.msrb.mxu0 %v1649_v36  ;;  %272 = vmatpush.msrb.mxu1 %v1654_v37  ;;  %2454 = vst [vmem:[#allocation12_spill] sm:$0xff] %v1707_v45  ;;  %v1712_v46 = vld [vmem:[%s2429_s3 + $0xb8] sm:$0xff]  ;;  %v1736_v50 = vld [vmem:[%s2429_s3 + $0xa0] sm:$0xff]  ;;  %v1742_v51 = vld [vmem:[%s2429_s3 + $0x8] sm:$0xff] }
  0x1b   :  { %199 = vmatpush.msra.mxu3 %v1661_v38  ;;  %2455 = vst [vmem:[#allocation13_spill] sm:$0xff] %v1719_v47  ;;  %301 = vmatpush.msrb.mxu2 %v1479_v5  ;;  %v1750_v52 = vld [vmem:[%s2429_s3 + $0x88] sm:$0xff]  ;;  %v1758_v53 = vld [vmem:[%s2429_s3 + $0x70] sm:$0xff]  ;;  %v1766_v54 = vld [vmem:[%s2429_s3 + $0x58] sm:$0xff] }
  0x1c   :  { %218 = vmatpush.msrb.mxu0 %v1668_v39  ;;  %273 = vmatpush.msrb.mxu1 %v1673_v40  ;;  %2456 = vst [vmem:[#allocation14_spill] sm:$0xff] %v1728_v49  ;;  %v1775_v55 = vld [vmem:[%s2429_s3 + $0x40] sm:$0xff]  ;;  %v1784_v56 = vld [vmem:[%s2429_s3 + $0x28] sm:$0xff]  ;;  %v1793_v57 = vld [vmem:[%s2429_s3 + $0x10] sm:$0xff] }
  0x1d   :  { %200 = vmatpush.msra.mxu3 %v1681_v41  ;;  %2457 = vst [vmem:[#allocation15_spill] sm:$0xff] %v1742_v51  ;;  %302 = vmatpush.msrb.mxu2 %v1491_v7  ;;  %v41_v58 = vld [vmem:[%s2430_s4] sm:$0x7]  ;;  %s1413_s4 = smov 2  }
  0x1e   :  { %219 = vmatpush.msrb.mxu0 %v1688_v42  ;;  %274 = vmatpush.msrb.mxu1 %v1693_v43  ;;  %2458 = vst [vmem:[#allocation16_spill] sm:$0xff] %v1784_v56  ;;  %v43_v59 = vperm.slane %v41_v58, 0  ;;  %v44_v62 = vperm.slane %v41_v58, 1 }
  0x1f   :  { %201 = vmatpush.msra.mxu3 %v1700_v44  ;;  %303 = vmatpush.msrb.mxu2 %v1503_v9  ;;  %2459 = vst [vmem:[#allocation17_spill] sm:$0xff] %v1793_v57 }
  0x20   :  { %220 = vmatpush.msrb.mxu0 %v1707_v45  ;;  %275 = vmatpush.msrb.mxu1 %v1712_v46 }
  0x21   :  { %202 = vmatpush.msra.mxu3 %v1719_v47  ;;  %304 = vmatpush.msrb.mxu2 %v1522_v13 }
  0x22   :  { %203 = vmatmul.f32.vlgmr.msra.gmra.mxu3 %v1723_v48  ;;  %221 = vmatpush.msrb.mxu0 %v1728_v49 }
  0x23   :  { %276 = vmatpush.msrb.mxu1 %v1736_v50  ;;  %319 = vmatpush.msrb.mxu3 %v1474_v4 }
  0x24   :  { %222 = vmatpush.msrb.mxu0 %v1742_v51  ;;  %305 = vmatpush.msrb.mxu2 %v1537_v16 }
  0x25   :  { %223 = vmatmul.f32.vlgmr.msrb.gmra.mxu0 %v1723_v48  ;;  %277 = vmatpush.msrb.mxu1 %v1750_v52 }
  0x26   :  { %385 = vmatpush.msra.mxu0 %v1569_v22  ;;  %320 = vmatpush.msrb.mxu3 %v1485_v6 }
  0x27   :  { %278 = vmatpush.msrb.mxu1 %v1758_v53  ;;  %306 = vmatpush.msrb.mxu2 %v1550_v18 }
  0x28   :  { %386 = vmatpush.msra.mxu0 %v1574_v23  ;;  %321 = vmatpush.msrb.mxu3 %v1497_v8 }
  0x29   :  { %279 = vmatpush.msrb.mxu1 %v1766_v54  ;;  %307 = vmatpush.msrb.mxu2 %v1580_v24 }
  0x2a   :  { %387 = vmatpush.msra.mxu0 %v1594_v26  ;;  %322 = vmatpush.msrb.mxu3 %v1512_v11 }
  0x2b   :  { %280 = vmatpush.msrb.mxu1 %v1775_v55  ;;  %308 = vmatpush.msrb.mxu2 %v1603_v28 }
  0x2c   :  { %388 = vmatpush.msra.mxu0 %v1618_v31  ;;  %323 = vmatpush.msrb.mxu3 %v1531_v15 }
  0x2d   :  { %281 = vmatpush.msrb.mxu1 %v1784_v56  ;;  %309 = vmatpush.msrb.mxu2 %v1624_v32 }
  0x2e   :  { %389 = vmatpush.msra.mxu0 %v1636_v34  ;;  %324 = vmatpush.msrb.mxu3 %v1543_v17 }
  0x2f   :  { %282 = vmatpush.msrb.mxu1 %v1793_v57  ;;  %1207 = vmatmul.msk.f32.gmra.mxu2 %vm49_vm0, %v1555_v19  ;;  %v45_v19 = vperm.slane %v41_v58, 2 }
  0x30   :  { %283 = vmatmul.f32.vlgmr.msrb.gmra.mxu1 %v1723_v48  ;;  %390 = vmatpush.msra.mxu0 %v1654_v37 }
  0x31   :  { %325 = vmatpush.msrb.mxu3 %v1564_v21  ;;  %310 = vmatpush.msrb.mxu2 %v1642_v35 }
  0x32   :  { %391 = vmatpush.msra.mxu0 %v1673_v40  ;;  %427 = vmatpush.msra.mxu1 %v1460_v1 }
  0x33   :  { %326 = vmatpush.msrb.mxu3 %v1587_v25  ;;  %311 = vmatpush.msrb.mxu2 %v1661_v38 }
  0x34   :  { %392 = vmatpush.msra.mxu0 %v1693_v43  ;;  %428 = vmatpush.msra.mxu1 %v1469_v3 }
  0x35   :  { %327 = vmatpush.msrb.mxu3 %v1613_v30  ;;  %312 = vmatpush.msrb.mxu2 %v1681_v41 }
  0x36   :  { %393 = vmatpush.msra.mxu0 %v1712_v46  ;;  %429 = vmatpush.msra.mxu1 %v1479_v5 }
  0x37   :  { %328 = vmatpush.msrb.mxu3 %v1629_v33  ;;  %313 = vmatpush.msrb.mxu2 %v1700_v44 }
  0x38   :  { %394 = vmatpush.msra.mxu0 %v1736_v50  ;;  %430 = vmatpush.msra.mxu1 %v1491_v7 }
  0x39   :  { %329 = vmatpush.msrb.mxu3 %v1649_v36  ;;  %314 = vmatpush.msrb.mxu2 %v1719_v47 }
  0x3a   :  { %395 = vmatpush.msra.mxu0 %v1750_v52  ;;  %431 = vmatpush.msra.mxu1 %v1503_v9 }
  0x3b   :  { %330 = vmatpush.msrb.mxu3 %v1668_v39  ;;  %447 = vmatpush.msra.mxu2 %v1474_v4 }
  0x3c   :  { %396 = vmatpush.msra.mxu0 %v1758_v53  ;;  %432 = vmatpush.msra.mxu1 %v1522_v13 }
  0x3d   :  { %331 = vmatpush.msrb.mxu3 %v1688_v42  ;;  %448 = vmatpush.msra.mxu2 %v1485_v6 }
  0x3e   :  { %397 = vmatpush.msra.mxu0 %v1766_v54  ;;  %433 = vmatpush.msra.mxu1 %v1537_v16 }
  0x3f   :  { %332 = vmatpush.msrb.mxu3 %v1707_v45  ;;  %449 = vmatpush.msra.mxu2 %v1497_v8 }
  0x40   :  { %398 = vmatpush.msra.mxu0 %v1775_v55  ;;  %434 = vmatpush.msra.mxu1 %v1550_v18 }
  0x41   :  { %333 = vmatpush.msrb.mxu3 %v1728_v49  ;;  %450 = vmatpush.msra.mxu2 %v1512_v11 }
  0x42   :  { %399 = vmatpush.msra.mxu0 %v1784_v56  ;;  %435 = vmatpush.msra.mxu1 %v1580_v24 }
  0x43   :  { %334 = vmatpush.msrb.mxu3 %v1742_v51  ;;  %451 = vmatpush.msra.mxu2 %v1531_v15 }
  0x44   :  { %400 = vmatpush.msra.mxu0 %v1793_v57  ;;  %436 = vmatpush.msra.mxu1 %v1603_v28 }
  0x45   :  { %513 = vmatpush.msra.mxu3 %v1569_v22  ;;  %452 = vmatpush.msra.mxu2 %v1543_v17 }
  0x46   :  { %554 = vmatpush.msrb.mxu0 %v1460_v1  ;;  %437 = vmatpush.msra.mxu1 %v1624_v32 }
  0x47   :  { %514 = vmatpush.msra.mxu3 %v1574_v23  ;;  %453 = vmatpush.msra.mxu2 %v1564_v21 }
  0x48   :  { %555 = vmatpush.msrb.mxu0 %v1469_v3  ;;  %438 = vmatpush.msra.mxu1 %v1642_v35 }
  0x49   :  { %515 = vmatpush.msra.mxu3 %v1594_v26  ;;  %454 = vmatpush.msra.mxu2 %v1587_v25 }
  0x4a   :  { %556 = vmatpush.msrb.mxu0 %v1479_v5  ;;  %439 = vmatpush.msra.mxu1 %v1661_v38 }
  0x4b   :  { %516 = vmatpush.msra.mxu3 %v1618_v31  ;;  %455 = vmatpush.msra.mxu2 %v1613_v30 }
  0x4c   :  { %557 = vmatpush.msrb.mxu0 %v1491_v7  ;;  %440 = vmatpush.msra.mxu1 %v1681_v41 }
  0x4d   :  { %517 = vmatpush.msra.mxu3 %v1636_v34  ;;  %456 = vmatpush.msra.mxu2 %v1629_v33 }
  0x4e   :  { %558 = vmatpush.msrb.mxu0 %v1503_v9  ;;  %441 = vmatpush.msra.mxu1 %v1700_v44 }
  0x4f   :  { %518 = vmatpush.msra.mxu3 %v1654_v37  ;;  %457 = vmatpush.msra.mxu2 %v1649_v36 }
  0x50   :  { %559 = vmatpush.msrb.mxu0 %v1522_v13  ;;  %442 = vmatpush.msra.mxu1 %v1719_v47 }
  0x51   :  { %519 = vmatpush.msra.mxu3 %v1673_v40  ;;  %458 = vmatpush.msra.mxu2 %v1668_v39 }
  0x52   :  { %560 = vmatpush.msrb.mxu0 %v1537_v16  ;;  %574 = vmatpush.msrb.mxu1 %v1474_v4 }
  0x53   :  { %520 = vmatpush.msra.mxu3 %v1693_v43  ;;  %459 = vmatpush.msra.mxu2 %v1688_v42 }
  0x54   :  { %561 = vmatpush.msrb.mxu0 %v1550_v18  ;;  %575 = vmatpush.msrb.mxu1 %v1485_v6 }
  0x55   :  { %521 = vmatpush.msra.mxu3 %v1712_v46  ;;  %460 = vmatpush.msra.mxu2 %v1707_v45 }
  0x56   :  { %562 = vmatpush.msrb.mxu0 %v1580_v24  ;;  %576 = vmatpush.msrb.mxu1 %v1497_v8 }
  0x57   :  { %522 = vmatpush.msra.mxu3 %v1736_v50  ;;  %461 = vmatpush.msra.mxu2 %v1728_v49 }
  0x58   :  { %563 = vmatpush.msrb.mxu0 %v1603_v28  ;;  %577 = vmatpush.msrb.mxu1 %v1512_v11 }
  0x59   :  { %523 = vmatpush.msra.mxu3 %v1750_v52  ;;  %462 = vmatpush.msra.mxu2 %v1742_v51 }
  0x5a   :  { %564 = vmatpush.msrb.mxu0 %v1624_v32  ;;  %578 = vmatpush.msrb.mxu1 %v1531_v15 }
  0x5b   :  { %524 = vmatpush.msra.mxu3 %v1758_v53 }
  0x5c   :  { %565 = vmatpush.msrb.mxu0 %v1642_v35  ;;  %579 = vmatpush.msrb.mxu1 %v1543_v17 }
  0x5d   :  { %525 = vmatpush.msra.mxu3 %v1766_v54 }
  0x5e   :  { %566 = vmatpush.msrb.mxu0 %v1661_v38  ;;  %580 = vmatpush.msrb.mxu1 %v1564_v21 }
  0x5f   :  { %526 = vmatpush.msra.mxu3 %v1775_v55 }
  0x60   :  { %567 = vmatpush.msrb.mxu0 %v1681_v41  ;;  %581 = vmatpush.msrb.mxu1 %v1587_v25 }
  0x61   :  { %527 = vmatpush.msra.mxu3 %v1784_v56 }
  0x62   :  { %568 = vmatpush.msrb.mxu0 %v1700_v44  ;;  %582 = vmatpush.msrb.mxu1 %v1613_v30 }
  0x63   :  { %528 = vmatpush.msra.mxu3 %v1793_v57 }
  0x64   :  { %569 = vmatpush.msrb.mxu0 %v1719_v47  ;;  %583 = vmatpush.msrb.mxu1 %v1629_v33 }
  0x66   :  { %584 = vmatpush.msrb.mxu1 %v1649_v36 }
  0x68   :  { %585 = vmatpush.msrb.mxu1 %v1668_v39 }
  0x6a   :  { %586 = vmatpush.msrb.mxu1 %v1688_v42 }
  0x6c   :  { %587 = vmatpush.msrb.mxu1 %v1707_v45 }
  0x6e   :  { %588 = vmatpush.msrb.mxu1 %v1728_v49 }
  0x70   :  { %589 = vmatpush.msrb.mxu1 %v1742_v51 }
  0x82   :  { %v73_v60 = vpop.f32.mrf.mxu0 }
  0x83   :  { %v74_v61 = vadd.f32 %v73_v60, %v43_v59 }
  0x85   :  { %125 = vst [vmem:[#allocation2 + $0x28] sm:$0xff] %v74_v61 }
  0x88   :  { %v96_v63 = vpop.f32.mrf.mxu1 }
  0x89   :  { %v97_v0 = vadd.f32 %v96_v63, %v44_v62 }
  0x8a   :  { %v76_v2 = vpop.f32.mrf.mxu0 }
  0x8b   :  { %126 = vst [vmem:[#allocation2 + $0x10] sm:$0xff] %v97_v0  ;;  %v77_v10 = vadd.f32 %v76_v2, %v43_v59 }
  0x8c   :  { %v184_v57 = vld [vmem:[#allocation2 + $0x28] sm:$0x3] }
  0x8d   :  { %128 = vst [vmem:[#allocation2] sm:$0xff] %v77_v10 }
  0x92   :  { %v185_v29 = vld [vmem:[#allocation2 + $0x10] sm:$0x3] }
  0x96   :  { %v99_v12 = vpop.f32.mrf.mxu1 }
  0x97   :  { %v100_v14 = vadd.f32 %v99_v12, %v44_v62 }
  0x98   :  { %v119_v20 = vpop.f32.mrf.mxu2 }
  0x99   :  { %129 = vst [vmem:[#allocation2 + $0x18] sm:$0xff] %v100_v14  ;;  %v120_v27 = vadd.f32 %v119_v20, %v45_v19 }
  0x9b   :  { %127 = vst [vmem:[#allocation2 + $0x8] sm:$0xff] %v120_v27 }
  0xa2   :  { %v224_v51 = vpop.f32.mrf.mxu0 }
  0xa3   :  { %v247_v47 = vadd.f32 %v224_v51, %v185_v29 }
  0xa5   :  { %v1209_v60 = vmul.f32 -1.442695, %v247_v47  ;;  %v204_v49 = vpop.f32.mrf.mxu3  ;;  %v1919_v47 = vld [vmem:[%s2431_s5] ss:$0 sm:$0xff] }
  0xa6   :  { %v227_v61 = vadd.f32 %v204_v49, %v184_v57  ;;  %2460 = vst [vmem:[#allocation18_spill] sm:$0xff] %v1919_v47 }
  0xa7   :  { %1229 = vpow2.f32 %v1209_v60 }
  0xa8   :  { %v1208_v63 = vmul.f32 -1.442695, %v227_v61 }
  0xaa   :  { %1231 = vpow2.f32 %v1208_v63 }
  0xad   :  { %v1230_v0 = vpop.eup %1229  ;;  %v284_v29 = vpop.f32.mrf.mxu1 }
  0xae   :  { %v251_v59 = vadd.f32 1.0, %v1230_v0 }
  0xb0   :  { %v1232_v2 = vpop.eup %1231  ;;  %1233 = vrcp.f32 %v251_v59  ;;  %vm257_vm3 = vweird.f32 %v251_v59  ;;  %v261_v44 = vand.u32 2147483647, %v251_v59 }
  0xb1   :  { %v231_v62 = vadd.f32 1.0, %v1232_v2 }
  0xb2   :  { %v122_v58 = vpop.f32.mrf.mxu2  ;;  %vm262_vm8 = vcmp.eq.f32.partialorder %v261_v44, 8.507059e+37  ;;  %v2462_v44 = vld [vmem:[#allocation12_spill] sm:$0xff] }
  0xb3   :  { %1235 = vrcp.f32 %v231_v62  ;;  %v123_v12 = vadd.f32 %v122_v58, %v45_v19  ;;  %v243_v57 = vand.u32 2147483648, %v231_v62  ;;  %v241_v61 = vand.u32 2147483647, %v231_v62 }
  0xb4   :  { %vm237_vm2 = vweird.f32 %v231_v62  ;;  %v285_v19 = vadd.f32 %v1919_v47, %v284_v29  ;;  %v263_v58 = vand.u32 2147483648, %v251_v59 }
  0xb5   :  { %130 = vst [vmem:[#allocation2 + $0x20] sm:$0xff] %v123_v12  ;;  %v244_v2 = vor.u32 1.1754944e-38, %v243_v57  ;;  %vm242_vm6 = vcmp.eq.f32.partialorder %v241_v61, 8.507059e+37 }
  0xb6   :  { %v1234_v10 = vpop.eup %1233  ;;  %v264_v45 = vor.u32 1.1754944e-38, %v263_v58  ;;  %v297_v58 = vld [vmem:[#allocation2 + $0x10] sm:$0xc] }
  0xb7   :  { %v253_v14 = vmul.f32 %v1234_v10, %v251_v59  ;;  %vm258_vm4 = vweird.f32 %v1234_v10  ;;  %v2466_v59 = vld [vmem:[#allocation17_spill] sm:$0xff] }
  0xb8   :  { %vm259_vm7 = vmor %vm257_vm3, %vm258_vm4 }
  0xb9   :  { %v1236_v20 = vpop.eup %1235  ;;  %v254_v27 = vsub.f32 1.0, %v253_v14 }
  0xba   :  { %v233_v51 = vmul.f32 %v1236_v20, %v231_v62  ;;  %vm238_vm1 = vweird.f32 %v1236_v20 }
  0xbb   :  { %v255_v63 = vmul.f32 %v1234_v10, %v254_v27  ;;  %vm239_vm5 = vmor %vm237_vm2, %vm238_vm1  ;;  %vm419_vm2 = vcmask 257026  }
  0xbc   :  { %v234_v49 = vsub.f32 1.0, %v233_v51  ;;  %v186_v51 = vld [vmem:[#allocation2 + $0x8] sm:$0x3] }
  0xbd   :  { %v256_v14 = vadd.f32 %v1234_v10, %v255_v63 }
  0xbe   :  { %v235_v60 = vmul.f32 %v1236_v20, %v234_v49 }
  0xbf   :  { %v260_v27 = vsel %vm259_vm7, %v1234_v10, %v256_v14  ;;  %v2467_v10 = vld [vmem:[#allocation13_spill] sm:$0xff] }
  0xc0   :  { %v236_v0 = vadd.f32 %v1236_v20, %v235_v60  ;;  %v265_v62 = vsel %vm262_vm8, %v264_v45, %v260_v27  ;;  %v2463_v45 = vld [vmem:[#allocation16_spill] sm:$0xff] }
  0xc1   :  { %v290_v29 = vsub.f32 1.0, %v265_v62  ;;  %v292_v57 = vmul.f32 %v265_v62, %v1723_v48  ;;  %v2464_v48 = vld [vmem:[#allocation11_spill] sm:$0xff] }
  0xc2   :  { %v240_v12 = vsel %vm239_vm5, %v1236_v20, %v236_v0 }
  0xc3   :  { %v245_v56 = vsel %vm242_vm6, %v244_v2, %v240_v12  ;;  %v296_v2 = vld [vmem:[#allocation2 + $0x28] sm:$0xc] }
  0xc4   :  { %v287_v49 = vmul.f32 %v285_v19, %v245_v56  ;;  %v2465_v56 = vld [vmem:[#allocation14_spill] sm:$0xff] }
  0xc6   :  { %v288_v41 = vadd.f32 %v287_v49, %v186_v51 }
  0xc8   :  { %1237 = vtanh.f32 %v288_v41  ;;  %v2461_v41 = vld [vmem:[#allocation10_spill] sm:$0xff] }
  0xce   :  { %v1238_v60 = vpop.eup %1237 }
  0xcf   :  { %v291_v47 = vmul.f32 %v1238_v60, %v290_v29 }
  0xd1   :  { %v1923_v20 = vadd.f32 %v292_v57, %v291_v47  ;;  %v2468_v47 = vld [vmem:[#allocation15_spill] sm:$0xff] }
  0xd3   :  { %295 = vst.msk [vmem:[#allocation4] sm:$0x3] %vm294_vm9, %v1923_v20  ;;  %315 = vmatmul.f32.vlgmr.msrb.gmra.mxu2 %v1923_v20  ;;  %335 = vmatmul.f32.vlgmr.msrb.gmra.mxu3 %v1923_v20 }
  0xd4   :  { %401 = vmatmul.f32.vlgmr.msra.gmra.mxu0 %v1923_v20  ;;  %640 = vmatpush.msrb.mxu2 %v1569_v22 }
  0xd5   :  { %681 = vmatpush.msrb.mxu3 %v1460_v1  ;;  %701 = vmatpush.msra.mxu0 %v1474_v4 }
  0xd6   :  { %641 = vmatpush.msrb.mxu2 %v1574_v23 }
  0xd7   :  { %682 = vmatpush.msrb.mxu3 %v1469_v3  ;;  %702 = vmatpush.msra.mxu0 %v1485_v6 }
  0xd8   :  { %642 = vmatpush.msrb.mxu2 %v1594_v26 }
  0xd9   :  { %683 = vmatpush.msrb.mxu3 %v1479_v5  ;;  %703 = vmatpush.msra.mxu0 %v1497_v8 }
  0xda   :  { %643 = vmatpush.msrb.mxu2 %v1618_v31 }
  0xdb   :  { %684 = vmatpush.msrb.mxu3 %v1491_v7  ;;  %704 = vmatpush.msra.mxu0 %v1512_v11 }
  0xdc   :  { %644 = vmatpush.msrb.mxu2 %v1636_v34 }
  0xdd   :  { %685 = vmatpush.msrb.mxu3 %v1503_v9  ;;  %705 = vmatpush.msra.mxu0 %v1531_v15 }
  0xde   :  { %645 = vmatpush.msrb.mxu2 %v1654_v37 }
  0xdf   :  { %686 = vmatpush.msrb.mxu3 %v1522_v13  ;;  %706 = vmatpush.msra.mxu0 %v1543_v17 }
  0xe0   :  { %646 = vmatpush.msrb.mxu2 %v1673_v40 }
  0xe1   :  { %687 = vmatpush.msrb.mxu3 %v1537_v16  ;;  %707 = vmatpush.msra.mxu0 %v1564_v21 }
  0xe2   :  { %647 = vmatpush.msrb.mxu2 %v1693_v43 }
  0xe3   :  { %688 = vmatpush.msrb.mxu3 %v1550_v18  ;;  %708 = vmatpush.msra.mxu0 %v1587_v25 }
  0xe4   :  { %648 = vmatpush.msrb.mxu2 %v1712_v46 }
  0xe5   :  { %689 = vmatpush.msrb.mxu3 %v1580_v24  ;;  %709 = vmatpush.msra.mxu0 %v1613_v30 }
  0xe6   :  { %649 = vmatpush.msrb.mxu2 %v1736_v50 }
  0xe7   :  { %690 = vmatpush.msrb.mxu3 %v1603_v28  ;;  %710 = vmatpush.msra.mxu0 %v1629_v33 }
  0xe8   :  { %650 = vmatpush.msrb.mxu2 %v1750_v52 }
  0xe9   :  { %691 = vmatpush.msrb.mxu3 %v1624_v32  ;;  %711 = vmatpush.msra.mxu0 %v1649_v36 }
  0xea   :  { %651 = vmatpush.msrb.mxu2 %v1758_v53 }
  0xeb   :  { %692 = vmatpush.msrb.mxu3 %v1642_v35  ;;  %712 = vmatpush.msra.mxu0 %v1668_v39 }
  0xec   :  { %652 = vmatpush.msrb.mxu2 %v1766_v54 }
  0xed   :  { %693 = vmatpush.msrb.mxu3 %v1661_v38  ;;  %713 = vmatpush.msra.mxu0 %v1688_v42 }
  0xee   :  { %653 = vmatpush.msrb.mxu2 %v1775_v55 }
  0xef   :  { %694 = vmatpush.msrb.mxu3 %v2461_v41  ;;  %714 = vmatpush.msra.mxu0 %v2462_v44 }
  0xf0   :  { %654 = vmatpush.msrb.mxu2 %v2463_v45 }
  0xf1   :  { %695 = vmatpush.msrb.mxu3 %v2464_v48  ;;  %715 = vmatpush.msra.mxu0 %v2465_v56 }
  0xf2   :  { %655 = vmatpush.msrb.mxu2 %v2466_v59 }
  0xf3   :  { %696 = vmatpush.msrb.mxu3 %v2467_v10  ;;  %716 = vmatpush.msra.mxu0 %v2468_v47 }
 0x151   :  { %v402_v59 = vpop.f32.mrf.mxu0 }
 0x156   :  { %v316_v61 = vpop.f32.mrf.mxu2  ;;  %v336_v63 = vpop.f32.mrf.mxu3 }
 0x157   :  { %v340_v0 = vrot.slane %v316_v61, 6  ;;  %v363_v19 = vrot.slane %v336_v63, 6 }
 0x159   :  { %v342_v12 = vadd.f32 %v340_v0, %v296_v2  ;;  %v365_v14 = vadd.f32 %v363_v19, %v297_v58  ;;  %v2469_v0 = vld [vmem:[#allocation18_spill] sm:$0xff] }
 0x15a   :  { %v403_v19 = vadd.f32 %v2469_v0, %v402_v59 }
 0x15b   :  { %v1210_v51 = vmul.f32 -1.442695, %v342_v12  ;;  %v1211_v49 = vmul.f32 -1.442695, %v365_v14 }
 0x15d   :  { %1239 = vpow2.f32 %v1210_v51 }
 0x15e   :  { %1241 = vpow2.f32 %v1211_v49  ;;  %v406_v49 = vrot.slane %v403_v19, 6 }
 0x163   :  { %v1240_v27 = vpop.eup %1239 }
 0x164   :  { %v1242_v62 = vpop.eup %1241  ;;  %v346_v29 = vadd.f32 1.0, %v1240_v27 }
 0x165   :  { %v369_v60 = vadd.f32 1.0, %v1242_v62 }
 0x166   :  { %1243 = vrcp.f32 %v346_v29  ;;  %v358_v56 = vand.u32 2147483648, %v346_v29  ;;  %v356_v58 = vand.u32 2147483647, %v346_v29  ;;  %vm352_vm11 = vweird.f32 %v346_v29 }
 0x167   :  { %1245 = vrcp.f32 %v369_v60  ;;  %vm375_vm15 = vweird.f32 %v369_v60  ;;  %v379_v41 = vand.u32 2147483647, %v369_v60 }
 0x168   :  { %v359_v51 = vor.u32 1.1754944e-38, %v358_v56  ;;  %vm357_vm13 = vcmp.eq.f32.partialorder %v356_v58, 8.507059e+37  ;;  %v414_v56 = vrot.slane %v1923_v20, 6 }
 0x169   :  { %vm380_vm1 = vcmp.eq.f32.partialorder %v379_v41, 8.507059e+37 }
 0x16c   :  { %v1244_v57 = vpop.eup %1243 }
 0x16d   :  { %v1246_v47 = vpop.eup %1245  ;;  %v348_v10 = vmul.f32 %v1244_v57, %v346_v29  ;;  %vm353_vm10 = vweird.f32 %v1244_v57 }
 0x16e   :  { %v371_v61 = vmul.f32 %v1246_v47, %v369_v60  ;;  %vm354_vm12 = vmor %vm352_vm11, %vm353_vm10  ;;  %vm376_vm14 = vweird.f32 %v1246_v47 }
 0x16f   :  { %v349_v63 = vsub.f32 1.0, %v348_v10  ;;  %v381_v10 = vand.u32 2147483648, %v369_v60  ;;  %vm377_vm0 = vmor %vm375_vm15, %vm376_vm14 }
 0x170   :  { %v372_v48 = vsub.f32 1.0, %v371_v61  ;;  %v298_v61 = vld [vmem:[#allocation2 + $0x8] sm:$0xc] }
 0x171   :  { %v350_v2 = vmul.f32 %v1244_v57, %v349_v63  ;;  %v382_v0 = vor.u32 1.1754944e-38, %v381_v10 }
 0x172   :  { %v373_v12 = vmul.f32 %v1246_v47, %v372_v48 }
 0x173   :  { %v351_v14 = vadd.f32 %v1244_v57, %v350_v2 }
 0x174   :  { %v374_v45 = vadd.f32 %v1246_v47, %v373_v12 }
 0x175   :  { %v355_v27 = vsel %vm354_vm12, %v1244_v57, %v351_v14  ;;  %vm546_vm12 = vcmask 259076  }
 0x176   :  { %v360_v62 = vsel %vm357_vm13, %v359_v51, %v355_v27  ;;  %v378_v63 = vsel %vm377_vm0, %v1246_v47, %v374_v45 }
 0x177   :  { %v408_v44 = vmul.f32 %v406_v49, %v360_v62  ;;  %v383_v48 = vsel %vm380_vm1, %v382_v0, %v378_v63 }
 0x178   :  { %v411_v29 = vsub.f32 1.0, %v383_v48  ;;  %v416_v2 = vmul.f32 %v414_v56, %v383_v48 }
 0x179   :  { %v409_v59 = vadd.f32 %v408_v44, %v298_v61  ;;  %v423_v61 = vld [vmem:[#allocation2 + $0x8] sm:$0x30] }
 0x17b   :  { %1247 = vtanh.f32 %v409_v59 }
 0x181   :  { %v1248_v57 = vpop.eup %1247 }
 0x182   :  { %v412_v19 = vmul.f32 %v1248_v57, %v411_v29 }
 0x184   :  { %v1980_v58 = vadd.f32 %v416_v2, %v412_v19 }
 0x186   :  { %420 = vst.msk [vmem:[#allocation4] sm:$0xc] %vm419_vm2, %v1980_v58  ;;  %v425_v60 = vrot.slane %v1980_v58, 2  ;;  %v541_v19 = vrot.slane %v1980_v58, 6  ;;  %v2049_v58 = vld [vmem:[%s2429_s3 + $0x168] sm:$0xff] }
 0x188   :  { %443 = vmatmul.f32.vlgmr.msra.gmra.mxu1 %v425_v60  ;;  %463 = vmatmul.f32.vlgmr.msra.gmra.mxu2 %v425_v60 }
 0x189   :  { %529 = vmatmul.f32.vlgmr.msra.gmra.mxu3 %v425_v60  ;;  %761 = vmatpush.msra.mxu1 %v1569_v22  ;;  %v422_v22 = vld [vmem:[#allocation2 + $0x10] sm:$0x30] }
 0x18a   :  { %793 = vmatpush.msra.mxu2 %v1460_v1  ;;  %813 = vmatpush.msra.mxu3 %v1474_v4  ;;  %v2470_v1 = vld [vmem:[#allocation10_spill] sm:$0xff]  ;;  %v2472_v4 = vld [vmem:[#allocation16_spill] sm:$0xff] }
 0x18b   :  { %762 = vmatpush.msra.mxu1 %v1574_v23 }
 0x18c   :  { %794 = vmatpush.msra.mxu2 %v1469_v3  ;;  %814 = vmatpush.msra.mxu3 %v1485_v6  ;;  %v2471_v3 = vld [vmem:[#allocation12_spill] sm:$0xff]  ;;  %v2474_v6 = vld [vmem:[#allocation14_spill] sm:$0xff] }
 0x18d   :  { %763 = vmatpush.msra.mxu1 %v1594_v26 }
 0x18e   :  { %795 = vmatpush.msra.mxu2 %v1479_v5  ;;  %815 = vmatpush.msra.mxu3 %v1497_v8  ;;  %v2473_v5 = vld [vmem:[#allocation11_spill] sm:$0xff]  ;;  %v2476_v8 = vld [vmem:[#allocation13_spill] sm:$0xff] }
 0x18f   :  { %764 = vmatpush.msra.mxu1 %v1618_v31 }
 0x190   :  { %796 = vmatpush.msra.mxu2 %v1491_v7  ;;  %816 = vmatpush.msra.mxu3 %v1512_v11  ;;  %v2475_v7 = vld [vmem:[#allocation17_spill] sm:$0xff] }
 0x191   :  { %765 = vmatpush.msra.mxu1 %v1636_v34 }
 0x192   :  { %797 = vmatpush.msra.mxu2 %v1503_v9  ;;  %817 = vmatpush.msra.mxu3 %v1531_v15  ;;  %v2477_v9 = vld [vmem:[#allocation15_spill] sm:$0xff] }
 0x193   :  { %766 = vmatpush.msra.mxu1 %v1654_v37  ;;  %v421_v15 = vld [vmem:[#allocation2 + $0x28] sm:$0x30] }
 0x194   :  { %798 = vmatpush.msra.mxu2 %v1522_v13  ;;  %818 = vmatpush.msra.mxu3 %v1543_v17 }
 0x195   :  { %767 = vmatpush.msra.mxu1 %v1673_v40 }
 0x196   :  { %799 = vmatpush.msra.mxu2 %v1537_v16  ;;  %819 = vmatpush.msra.mxu3 %v1564_v21 }
 0x197   :  { %768 = vmatpush.msra.mxu1 %v1693_v43 }
 0x198   :  { %800 = vmatpush.msra.mxu2 %v1550_v18  ;;  %820 = vmatpush.msra.mxu3 %v1587_v25 }
 0x199   :  { %769 = vmatpush.msra.mxu1 %v1712_v46 }
 0x19a   :  { %801 = vmatpush.msra.mxu2 %v1580_v24  ;;  %821 = vmatpush.msra.mxu3 %v1613_v30 }
 0x19b   :  { %770 = vmatpush.msra.mxu1 %v1736_v50 }
 0x19c   :  { %802 = vmatpush.msra.mxu2 %v1603_v28  ;;  %822 = vmatpush.msra.mxu3 %v1629_v33 }
 0x19d   :  { %771 = vmatpush.msra.mxu1 %v1750_v52 }
 0x19e   :  { %803 = vmatpush.msra.mxu2 %v1624_v32  ;;  %823 = vmatpush.msra.mxu3 %v1649_v36 }
 0x19f   :  { %772 = vmatpush.msra.mxu1 %v1758_v53 }
 0x1a0   :  { %804 = vmatpush.msra.mxu2 %v1642_v35  ;;  %824 = vmatpush.msra.mxu3 %v1668_v39 }
 0x1a1   :  { %773 = vmatpush.msra.mxu1 %v1766_v54 }
 0x1a2   :  { %805 = vmatpush.msra.mxu2 %v1661_v38  ;;  %825 = vmatpush.msra.mxu3 %v1688_v42  ;;  %v2478_v42 = vld [vmem:[#allocation18_spill] sm:$0xff] }
 0x1a3   :  { %774 = vmatpush.msra.mxu1 %v1775_v55 }
 0x1a4   :  { %806 = vmatpush.msra.mxu2 %v2470_v1  ;;  %826 = vmatpush.msra.mxu3 %v2471_v3 }
 0x1a5   :  { %775 = vmatpush.msra.mxu1 %v2472_v4 }
 0x1a6   :  { %807 = vmatpush.msra.mxu2 %v2473_v5  ;;  %827 = vmatpush.msra.mxu3 %v2474_v6 }
 0x1a7   :  { %776 = vmatpush.msra.mxu1 %v2475_v7 }
 0x1a8   :  { %808 = vmatpush.msra.mxu2 %v2476_v8  ;;  %828 = vmatpush.msra.mxu3 %v2477_v9 }
 0x205   :  { %v444_v11 = vpop.f32.mrf.mxu1 }
 0x206   :  { %v468_v13 = vrot.slane %v444_v11, 4 }
 0x208   :  { %v470_v16 = vadd.f32 %v468_v13, %v421_v15  ;;  %v2043_v13 = vld [vmem:[%s2429_s3 + $0x178] sm:$0xff]  ;;  %v2055_v15 = vld [vmem:[%s2429_s3 + $0x170] sm:$0xff] }
 0x20a   :  { %v1212_v17 = vmul.f32 -1.442695, %v470_v16  ;;  %v2061_v16 = vld [vmem:[%s2429_s3 + $0x160] sm:$0xff] }
 0x20b   :  { %v464_v18 = vpop.f32.mrf.mxu2 }
 0x20c   :  { %1249 = vpow2.f32 %v1212_v17  ;;  %v491_v21 = vrot.slane %v464_v18, 4  ;;  %v530_v33 = vpop.f32.mrf.mxu3  ;;  %v2067_v17 = vld [vmem:[%s2429_s3 + $0x150] sm:$0xff]  ;;  %v2073_v18 = vld [vmem:[%s2429_s3 + $0x158] sm:$0xff] }
 0x20d   :  { %v531_v20 = vadd.f32 %v2478_v42, %v530_v33  ;;  %v2161_v33 = vld [vmem:[%s2429_s3 + $0xc8] sm:$0xff] }
 0x20e   :  { %v493_v23 = vadd.f32 %v491_v21, %v422_v22  ;;  %v2079_v21 = vld [vmem:[%s2429_s3 + $0x148] sm:$0xff]  ;;  %v2085_v22 = vld [vmem:[%s2429_s3 + $0x138] sm:$0xff] }
 0x20f   :  { %v534_v14 = vrot.slane %v531_v20, 4  ;;  %v2226_v20 = vld [vmem:[%s2429_s3 + $0x50] sm:$0xff] }
 0x210   :  { %v1213_v24 = vmul.f32 -1.442695, %v493_v23  ;;  %v2091_v23 = vld [vmem:[%s2429_s3 + $0x140] sm:$0xff] }
 0x212   :  { %v1250_v25 = vpop.eup %1249  ;;  %1251 = vpow2.f32 %v1213_v24  ;;  %v2097_v24 = vld [vmem:[%s2429_s3 + $0x130] sm:$0xff] }
 0x213   :  { %v474_v26 = vadd.f32 1.0, %v1250_v25  ;;  %v2103_v25 = vld [vmem:[%s2429_s3 + $0x120] sm:$0xff] }
 0x215   :  { %1253 = vrcp.f32 %v474_v26  ;;  %v486_v36 = vand.u32 2147483648, %v474_v26  ;;  %v484_v39 = vand.u32 2147483647, %v474_v26  ;;  %vm480_vm4 = vweird.f32 %v474_v26 }
 0x217   :  { %v487_v47 = vor.u32 1.1754944e-38, %v486_v36  ;;  %vm485_vm6 = vcmp.eq.f32.partialorder %v484_v39, 8.507059e+37  ;;  %v2187_v36 = vld [vmem:[%s2429_s3 + $0x98] sm:$0xff]  ;;  %v2213_v39 = vld [vmem:[%s2429_s3 + $0x68] sm:$0xff] }
 0x218   :  { %v1252_v28 = vpop.eup %1251 }
 0x219   :  { %v497_v30 = vadd.f32 1.0, %v1252_v28  ;;  %v2116_v28 = vld [vmem:[%s2429_s3 + $0x108] sm:$0xff] }
 0x21b   :  { %v1254_v31 = vpop.eup %1253  ;;  %1255 = vrcp.f32 %v497_v30  ;;  %v509_v27 = vand.u32 2147483648, %v497_v30  ;;  %v507_v10 = vand.u32 2147483647, %v497_v30  ;;  %vm503_vm8 = vweird.f32 %v497_v30 }
 0x21c   :  { %v476_v32 = vmul.f32 %v1254_v31, %v474_v26  ;;  %vm481_vm3 = vweird.f32 %v1254_v31  ;;  %v2109_v26 = vld [vmem:[%s2429_s3 + $0x128] sm:$0xff] }
 0x21d   :  { %vm482_vm5 = vmor %vm480_vm4, %vm481_vm3  ;;  %v510_v48 = vor.u32 1.1754944e-38, %v509_v27  ;;  %vm508_vm11 = vcmp.eq.f32.partialorder %v507_v10, 8.507059e+37 }
 0x21e   :  { %v477_v35 = vsub.f32 1.0, %v476_v32  ;;  %v2148_v32 = vld [vmem:[%s2429_s3 + $0xe0] sm:$0xff] }
 0x220   :  { %v478_v38 = vmul.f32 %v1254_v31, %v477_v35  ;;  %v2174_v35 = vld [vmem:[%s2429_s3 + $0xb0] sm:$0xff] }
 0x221   :  { %v1256_v41 = vpop.eup %1255 }
 0x222   :  { %v499_v44 = vmul.f32 %v1256_v41, %v497_v30  ;;  %v479_v45 = vadd.f32 %v1254_v31, %v478_v38  ;;  %vm504_vm7 = vweird.f32 %v1256_v41  ;;  %v2122_v30 = vld [vmem:[%s2429_s3 + $0x110] sm:$0xff]  ;;  %v2200_v38 = vld [vmem:[%s2429_s3 + $0x80] sm:$0xff] }
 0x223   :  { %vm505_vm10 = vmor %vm503_vm8, %vm504_vm7 }
 0x224   :  { %v500_v0 = vsub.f32 1.0, %v499_v44  ;;  %v483_v12 = vsel %vm482_vm5, %v1254_v31, %v479_v45  ;;  %v2135_v31 = vld [vmem:[%s2429_s3 + $0xf8] sm:$0xff] }
 0x225   :  { %v488_v51 = vsel %vm485_vm6, %v487_v47, %v483_v12  ;;  %v549_v47 = vld [vmem:[#allocation2 + $0x10] sm:$0xc0]  ;;  %vm673_vm6 = vcmask 261126  }
 0x226   :  { %v501_v49 = vmul.f32 %v1256_v41, %v500_v0  ;;  %v536_v62 = vmul.f32 %v534_v14, %v488_v51 }
 0x228   :  { %v502_v59 = vadd.f32 %v1256_v41, %v501_v49  ;;  %v537_v63 = vadd.f32 %v536_v62, %v423_v61 }
 0x22a   :  { %v506_v29 = vsel %vm505_vm10, %v1256_v41, %v502_v59  ;;  %1257 = vtanh.f32 %v537_v63  ;;  %v2241_v41 = vld [vmem:[%s2429_s3 + $0x18] sm:$0xff] }
 0x22b   :  { %v511_v56 = vsel %vm508_vm11, %v510_v48, %v506_v29 }
 0x22c   :  { %v539_v57 = vsub.f32 1.0, %v511_v56  ;;  %v543_v1 = vmul.f32 %v541_v19, %v511_v56 }
 0x230   :  { %v1258_v2 = vpop.eup %1257 }
 0x231   :  { %v540_v60 = vmul.f32 %v1258_v2, %v539_v57 }
 0x233   :  { %v2035_v5 = vadd.f32 %v543_v1, %v540_v60 }
 0x235   :  { %547 = vst.msk [vmem:[#allocation4] sm:$0x30] %vm546_vm12, %v2035_v5  ;;  %v552_v11 = vrot.slane %v2035_v5, 4 }
 0x237   :  { %570 = vmatmul.f32.vlgmr.msrb.gmra.mxu0 %v552_v11  ;;  %590 = vmatmul.f32.vlgmr.msrb.gmra.mxu1 %v552_v11 }
 0x238   :  { %656 = vmatmul.f32.vlgmr.msrb.gmra.mxu2 %v552_v11  ;;  %879 = vmatpush.msrb.mxu0 %v2043_v13 }
 0x239   :  { %920 = vmatpush.msrb.mxu1 %v2049_v58  ;;  %940 = vmatpush.msrb.mxu2 %v2055_v15 }
 0x23a   :  { %880 = vmatpush.msrb.mxu0 %v2061_v16 }
 0x23b   :  { %921 = vmatpush.msrb.mxu1 %v2067_v17  ;;  %941 = vmatpush.msrb.mxu2 %v2073_v18 }
 0x23c   :  { %881 = vmatpush.msrb.mxu0 %v2079_v21 }
 0x23d   :  { %922 = vmatpush.msrb.mxu1 %v2085_v22  ;;  %942 = vmatpush.msrb.mxu2 %v2091_v23 }
 0x23e   :  { %882 = vmatpush.msrb.mxu0 %v2097_v24 }
 0x23f   :  { %923 = vmatpush.msrb.mxu1 %v2103_v25  ;;  %943 = vmatpush.msrb.mxu2 %v2109_v26 }
 0x240   :  { %883 = vmatpush.msrb.mxu0 %v1636_v34  ;;  %v2129_v34 = vld [vmem:[%s2429_s3 + $0xf0] sm:$0xff] }
 0x241   :  { %924 = vmatpush.msrb.mxu1 %v2116_v28  ;;  %944 = vmatpush.msrb.mxu2 %v2122_v30 }
 0x242   :  { %884 = vmatpush.msrb.mxu0 %v1654_v37  ;;  %v2142_v37 = vld [vmem:[%s2429_s3 + $0xd8] sm:$0xff] }
 0x243   :  { %925 = vmatpush.msrb.mxu1 %v2129_v34  ;;  %945 = vmatpush.msrb.mxu2 %v2135_v31 }
 0x244   :  { %885 = vmatpush.msrb.mxu0 %v1673_v40  ;;  %v2155_v40 = vld [vmem:[%s2429_s3 + $0xc0] sm:$0xff] }
 0x245   :  { %926 = vmatpush.msrb.mxu1 %v2142_v37  ;;  %946 = vmatpush.msrb.mxu2 %v2148_v32 }
 0x246   :  { %886 = vmatpush.msrb.mxu0 %v1693_v43  ;;  %v2168_v43 = vld [vmem:[%s2429_s3 + $0xa8] sm:$0xff] }
 0x247   :  { %927 = vmatpush.msrb.mxu1 %v2155_v40  ;;  %947 = vmatpush.msrb.mxu2 %v2161_v33 }
 0x248   :  { %887 = vmatpush.msrb.mxu0 %v1712_v46  ;;  %v2181_v46 = vld [vmem:[%s2429_s3 + $0x90] sm:$0xff] }
 0x249   :  { %928 = vmatpush.msrb.mxu1 %v2168_v43  ;;  %948 = vmatpush.msrb.mxu2 %v2174_v35 }
 0x24a   :  { %888 = vmatpush.msrb.mxu0 %v1736_v50  ;;  %v2194_v50 = vld [vmem:[%s2429_s3 + $0x78] sm:$0xff] }
 0x24b   :  { %929 = vmatpush.msrb.mxu1 %v2181_v46  ;;  %949 = vmatpush.msrb.mxu2 %v2187_v36 }
 0x24c   :  { %889 = vmatpush.msrb.mxu0 %v1750_v52  ;;  %v2207_v52 = vld [vmem:[%s2429_s3 + $0x60] sm:$0xff] }
 0x24d   :  { %930 = vmatpush.msrb.mxu1 %v2194_v50  ;;  %950 = vmatpush.msrb.mxu2 %v2200_v38 }
 0x24e   :  { %890 = vmatpush.msrb.mxu0 %v1758_v53  ;;  %v2220_v53 = vld [vmem:[%s2429_s3 + $0x48] sm:$0xff] }
 0x24f   :  { %931 = vmatpush.msrb.mxu1 %v2207_v52  ;;  %951 = vmatpush.msrb.mxu2 %v2213_v39 }
 0x250   :  { %891 = vmatpush.msrb.mxu0 %v1766_v54  ;;  %v2233_v54 = vld [vmem:[%s2429_s3 + $0x30] sm:$0xff] }
 0x251   :  { %932 = vmatpush.msrb.mxu1 %v2220_v53  ;;  %952 = vmatpush.msrb.mxu2 %v2226_v20 }
 0x252   :  { %892 = vmatpush.msrb.mxu0 %v1775_v55 }
 0x253   :  { %933 = vmatpush.msrb.mxu1 %v2233_v54  ;;  %953 = vmatpush.msrb.mxu2 %v2471_v3 }
 0x254   :  { %893 = vmatpush.msrb.mxu0 %v2472_v4  ;;  %v548_v4 = vld [vmem:[#allocation2 + $0x28] sm:$0xc0] }
 0x255   :  { %934 = vmatpush.msrb.mxu1 %v2241_v41  ;;  %954 = vmatpush.msrb.mxu2 %v2474_v6 }
 0x256   :  { %894 = vmatpush.msrb.mxu0 %v2475_v7 }
 0x257   :  { %935 = vmatpush.msrb.mxu1 %v2476_v8  ;;  %955 = vmatpush.msrb.mxu2 %v2477_v9 }
 0x2b4   :  { %v571_v55 = vpop.f32.mrf.mxu0  ;;  %v591_v44 = vpop.f32.mrf.mxu1 }
 0x2b5   :  { %v595_v3 = vrot.slane %v571_v55, 2  ;;  %v618_v45 = vrot.slane %v591_v44, 2 }
 0x2b7   :  { %v597_v0 = vadd.f32 %v595_v3, %v548_v4  ;;  %v620_v12 = vadd.f32 %v618_v45, %v549_v47  ;;  %v550_v4 = vld [vmem:[#allocation2 + $0x8] sm:$0xc0] }
 0x2b9   :  { %v1214_v14 = vmul.f32 -1.442695, %v597_v0  ;;  %v1215_v51 = vmul.f32 -1.442695, %v620_v12 }
 0x2bb   :  { %1259 = vpow2.f32 %v1214_v14  ;;  %v657_v61 = vpop.f32.mrf.mxu2 }
 0x2bc   :  { %1261 = vpow2.f32 %v1215_v51  ;;  %v658_v57 = vadd.f32 %v2478_v42, %v657_v61 }
 0x2be   :  { %v661_v11 = vrot.slane %v658_v57, 2 }
 0x2c1   :  { %v1260_v49 = vpop.eup %1259 }
 0x2c2   :  { %v1262_v6 = vpop.eup %1261  ;;  %v601_v27 = vadd.f32 1.0, %v1260_v49 }
 0x2c3   :  { %v624_v7 = vadd.f32 1.0, %v1262_v6  ;;  %v668_v6 = vrot.slane %v2035_v5, 6  ;;  %v2271_v5 = vld [vmem:[%s2429_s3 + $0x118] sm:$0xff] }
 0x2c4   :  { %1263 = vrcp.f32 %v601_v27  ;;  %v613_v48 = vand.u32 2147483648, %v601_v27  ;;  %v611_v56 = vand.u32 2147483647, %v601_v27  ;;  %vm607_vm14 = vweird.f32 %v601_v27 }
 0x2c5   :  { %1265 = vrcp.f32 %v624_v7  ;;  %v636_v45 = vand.u32 2147483648, %v624_v7  ;;  %vm630_vm3 = vweird.f32 %v624_v7  ;;  %v634_v47 = vand.u32 2147483647, %v624_v7 }
 0x2c6   :  { %v614_v60 = vor.u32 1.1754944e-38, %v613_v48  ;;  %vm612_vm0 = vcmp.eq.f32.partialorder %v611_v56, 8.507059e+37 }
 0x2c7   :  { %v637_v14 = vor.u32 1.1754944e-38, %v636_v45  ;;  %vm635_vm5 = vcmp.eq.f32.partialorder %v634_v47, 8.507059e+37 }
 0x2ca   :  { %v1264_v8 = vpop.eup %1263 }
 0x2cb   :  { %v1266_v9 = vpop.eup %1265  ;;  %v603_v62 = vmul.f32 %v1264_v8, %v601_v27  ;;  %vm608_vm13 = vweird.f32 %v1264_v8 }
 0x2cc   :  { %v626_v10 = vmul.f32 %v1266_v9, %v624_v7  ;;  %vm609_vm15 = vmor %vm607_vm14, %vm608_vm13  ;;  %vm631_vm1 = vweird.f32 %v1266_v9 }
 0x2cd   :  { %v604_v59 = vsub.f32 1.0, %v603_v62  ;;  %vm632_vm4 = vmor %vm630_vm3, %vm631_vm1 }
 0x2ce   :  { %v627_v63 = vsub.f32 1.0, %v626_v10 }
 0x2cf   :  { %v605_v29 = vmul.f32 %v1264_v8, %v604_v59 }
 0x2d0   :  { %v628_v19 = vmul.f32 %v1266_v9, %v627_v63 }
 0x2d1   :  { %v606_v2 = vadd.f32 %v1264_v8, %v605_v29 }
 0x2d2   :  { %v629_v44 = vadd.f32 %v1266_v9, %v628_v19 }
 0x2d3   :  { %v610_v1 = vsel %vm609_vm15, %v1264_v8, %v606_v2 }
 0x2d4   :  { %v615_v55 = vsel %vm612_vm0, %v614_v60, %v610_v1  ;;  %v633_v12 = vsel %vm632_vm4, %v1266_v9, %v629_v44 }
 0x2d5   :  { %v663_v3 = vmul.f32 %v661_v11, %v615_v55  ;;  %v638_v51 = vsel %vm635_vm5, %v637_v14, %v633_v12 }
 0x2d6   :  { %v666_v49 = vsub.f32 1.0, %v638_v51  ;;  %v670_v62 = vmul.f32 %v668_v6, %v638_v51 }
 0x2d7   :  { %v664_v0 = vadd.f32 %v663_v3, %v550_v4 }
 0x2d9   :  { %1267 = vtanh.f32 %v664_v0  ;;  %v677_v0 = vld [vmem:[#allocation2 + $0x20] sm:$0x3] }
 0x2df   :  { %v1268_v27 = vpop.eup %1267 }
 0x2e0   :  { %v667_v8 = vmul.f32 %v1268_v27, %v666_v49 }
 0x2e2   :  { %v671_v10 = vadd.f32 %v670_v62, %v667_v8 }
 0x2e4   :  { %674 = vst.msk [vmem:[#allocation4] sm:$0xc0] %vm673_vm6, %v671_v10  ;;  %v2251_v61 = vrot.slane %v671_v10, 6  ;;  %v790_v10 = vld [vmem:[#allocation2] sm:$0xc] }
 0x2e6   :  { %697 = vmatmul.f32.vlgmr.msrb.gmra.mxu3 %v2251_v61  ;;  %717 = vmatmul.f32.vlgmr.msra.gmra.mxu0 %v2251_v61 }
 0x2e7   :  { %777 = vmatmul.f32.vlgmr.msra.gmra.mxu1 %v2251_v61  ;;  %1006 = vmatpush.msrb.mxu3 %v2043_v13 }
 0x2e8   :  { %1046 = vmatpush.msra.mxu0 %v2049_v58  ;;  %1066 = vmatpush.msra.mxu1 %v2055_v15  ;;  %v2279_v58 = vld [vmem:[%s2429_s3 + $0x100] sm:$0xff]  ;;  %v2287_v15 = vld [vmem:[%s2429_s3 + $0xe8] sm:$0xff] }
 0x2e9   :  { %1007 = vmatpush.msrb.mxu3 %v2061_v16 }
 0x2ea   :  { %1047 = vmatpush.msra.mxu0 %v2067_v17  ;;  %1067 = vmatpush.msra.mxu1 %v2073_v18  ;;  %v2295_v17 = vld [vmem:[%s2429_s3 + $0xd0] sm:$0xff]  ;;  %v2303_v18 = vld [vmem:[%s2429_s3 + $0xb8] sm:$0xff] }
 0x2eb   :  { %1008 = vmatpush.msrb.mxu3 %v2079_v21 }
 0x2ec   :  { %1048 = vmatpush.msra.mxu0 %v2085_v22  ;;  %1068 = vmatpush.msra.mxu1 %v2091_v23  ;;  %v2311_v22 = vld [vmem:[%s2429_s3 + $0xa0] sm:$0xff]  ;;  %v2319_v23 = vld [vmem:[%s2429_s3 + $0x88] sm:$0xff] }
 0x2ed   :  { %1009 = vmatpush.msrb.mxu3 %v2097_v24 }
 0x2ee   :  { %1049 = vmatpush.msra.mxu0 %v2103_v25  ;;  %1069 = vmatpush.msra.mxu1 %v2109_v26  ;;  %v2327_v25 = vld [vmem:[%s2429_s3 + $0x70] sm:$0xff]  ;;  %v2335_v26 = vld [vmem:[%s2429_s3 + $0x58] sm:$0xff] }
 0x2ef   :  { %1010 = vmatpush.msrb.mxu3 %v2271_v5 }
 0x2f0   :  { %1050 = vmatpush.msra.mxu0 %v2116_v28  ;;  %1070 = vmatpush.msra.mxu1 %v2122_v30  ;;  %v2343_v28 = vld [vmem:[%s2429_s3 + $0x40] sm:$0xff]  ;;  %v1351_v30 = vld [vmem:[%s2429_s3 + $0x38] sm:$0xff] }
 0x2f1   :  { %1011 = vmatpush.msrb.mxu3 %v2279_v58 }
 0x2f2   :  { %1051 = vmatpush.msra.mxu0 %v2129_v34  ;;  %1071 = vmatpush.msra.mxu1 %v2135_v31  ;;  %v2353_v34 = vld [vmem:[%s2429_s3 + $0x28] sm:$0xff]  ;;  %v1353_v31 = vld [vmem:[%s2429_s3 + $0x20] sm:$0xff] }
 0x2f3   :  { %1012 = vmatpush.msrb.mxu3 %v2287_v15 }
 0x2f4   :  { %1052 = vmatpush.msra.mxu0 %v2142_v37  ;;  %1072 = vmatpush.msra.mxu1 %v2148_v32  ;;  %v2363_v37 = vld [vmem:[%s2429_s3 + $0x10] sm:$0xff]  ;;  %v1355_v32 = vld [vmem:[%s2429_s3] sm:$0xff] }
 0x2f5   :  { %1013 = vmatpush.msrb.mxu3 %v2295_v17 }
 0x2f6   :  { %1053 = vmatpush.msra.mxu0 %v2155_v40  ;;  %1073 = vmatpush.msra.mxu1 %v2161_v33  ;;  %v1356_v40 = vld [vmem:[%s2429_s3 + $0x8] sm:$0xff]  ;;  %v676_v33 = vld [vmem:[#allocation2 + $0x18] sm:$0x3] }
 0x2f7   :  { %1014 = vmatpush.msrb.mxu3 %v2303_v18 }
 0x2f8   :  { %1054 = vmatpush.msra.mxu0 %v2168_v43  ;;  %1074 = vmatpush.msra.mxu1 %v2174_v35 }
 0x2f9   :  { %1015 = vmatpush.msrb.mxu3 %v2311_v22 }
 0x2fa   :  { %1055 = vmatpush.msra.mxu0 %v2181_v46  ;;  %1075 = vmatpush.msra.mxu1 %v2187_v36  ;;  %v675_v36 = vld [vmem:[#allocation2] sm:$0x3] }
 0x2fb   :  { %1016 = vmatpush.msrb.mxu3 %v2319_v23 }
 0x2fc   :  { %1056 = vmatpush.msra.mxu0 %v2194_v50  ;;  %1076 = vmatpush.msra.mxu1 %v2200_v38 }
 0x2fd   :  { %1017 = vmatpush.msrb.mxu3 %v2327_v25 }
 0x2fe   :  { %1057 = vmatpush.msra.mxu0 %v2207_v52  ;;  %1077 = vmatpush.msra.mxu1 %v2213_v39 }
 0x2ff   :  { %1018 = vmatpush.msrb.mxu3 %v2335_v26 }
 0x300   :  { %1058 = vmatpush.msra.mxu0 %v2220_v53  ;;  %1078 = vmatpush.msra.mxu1 %v2226_v20 }
 0x301   :  { %1019 = vmatpush.msrb.mxu3 %v2343_v28 }
 0x302   :  { %1059 = vmatpush.msra.mxu0 %v2233_v54  ;;  %1079 = vmatpush.msra.mxu1 %v1351_v30 }
 0x303   :  { %1020 = vmatpush.msrb.mxu3 %v2353_v34 }
 0x304   :  { %1060 = vmatpush.msra.mxu0 %v2241_v41  ;;  %1080 = vmatpush.msra.mxu1 %v1353_v31 }
 0x305   :  { %1021 = vmatpush.msrb.mxu3 %v2363_v37 }
 0x306   :  { %1061 = vmatpush.msra.mxu0 %v1355_v32  ;;  %1081 = vmatpush.msra.mxu1 %v1356_v40 }
 0x363   :  { %v718_v43 = vpop.f32.mrf.mxu0 }
 0x364   :  { %v741_v35 = vadd.f32 %v718_v43, %v676_v33  ;;  %v778_v2 = vpop.f32.mrf.mxu1  ;;  %v2400_v33 = vld [vmem:[%s2431_s5] ss:$0 sm:$0xff]  ;;  %s1410_s5 = smov [#allocation4]  }
 0x365   :  { %v779_v11 = vadd.f32 %v2478_v42, %v778_v2  ;;  %s1172_s8 = sshll.u32 %s1410_s5, 4  ;;  %s1173_s8 = int_to_ptr.vmem [resolvable:$true] %s1172_s8 }
 0x366   :  { %v1217_v46 = vmul.f32 -1.442695, %v741_v35 }
 0x368   :  { %1269 = vpow2.f32 %v1217_v46 }
 0x369   :  { %v698_v50 = vpop.f32.mrf.mxu3 }
 0x36a   :  { %v721_v38 = vadd.f32 %v698_v50, %v675_v36 }
 0x36c   :  { %v1216_v52 = vmul.f32 -1.442695, %v721_v38 }
 0x36e   :  { %v1270_v39 = vpop.eup %1269  ;;  %1271 = vpow2.f32 %v1216_v52 }
 0x36f   :  { %v745_v53 = vadd.f32 1.0, %v1270_v39 }
 0x371   :  { %1273 = vrcp.f32 %v745_v53  ;;  %v757_v45 = vand.u32 2147483648, %v745_v53  ;;  %vm751_vm14 = vweird.f32 %v745_v53  ;;  %v755_v47 = vand.u32 2147483647, %v745_v53 }
 0x373   :  { %v758_v51 = vor.u32 1.1754944e-38, %v757_v45  ;;  %vm756_vm0 = vcmp.eq.f32.partialorder %v755_v47, 8.507059e+37 }
 0x374   :  { %v1272_v20 = vpop.eup %1271 }
 0x375   :  { %v725_v54 = vadd.f32 1.0, %v1272_v20 }
 0x377   :  { %1275 = vrcp.f32 %v725_v54  ;;  %v1274_v41 = vpop.eup %1273  ;;  %v737_v29 = vand.u32 2147483648, %v725_v54  ;;  %v735_v57 = vand.u32 2147483647, %v725_v54  ;;  %vm731_vm8 = vweird.f32 %v725_v54 }
 0x378   :  { %v747_v7 = vmul.f32 %v1274_v41, %v745_v53  ;;  %vm752_vm13 = vweird.f32 %v1274_v41 }
 0x379   :  { %v738_v1 = vor.u32 1.1754944e-38, %v737_v29  ;;  %vm736_vm11 = vcmp.eq.f32.partialorder %v735_v57, 8.507059e+37  ;;  %vm753_vm15 = vmor %vm751_vm14, %vm752_vm13 }
 0x37a   :  { %v748_v63 = vsub.f32 1.0, %v747_v7  ;;  %v792_v7 = vld [vmem:[#allocation2 + $0x20] sm:$0xc] }
 0x37c   :  { %v749_v19 = vmul.f32 %v1274_v41, %v748_v63 }
 0x37d   :  { %v1276_v9 = vpop.eup %1275 }
 0x37e   :  { %v727_v59 = vmul.f32 %v1276_v9, %v725_v54  ;;  %vm732_vm7 = vweird.f32 %v1276_v9  ;;  %v750_v44 = vadd.f32 %v1274_v41, %v749_v19 }
 0x37f   :  { %vm733_vm10 = vmor %vm731_vm8, %vm732_vm7 }
 0x380   :  { %v728_v48 = vsub.f32 1.0, %v727_v59  ;;  %v754_v14 = vsel %vm753_vm15, %v1274_v41, %v750_v44 }
 0x381   :  { %v759_v49 = vsel %vm756_vm0, %v758_v51, %v754_v14 }
 0x382   :  { %v729_v56 = vmul.f32 %v1276_v9, %v728_v48  ;;  %v784_v6 = vsub.f32 1.0, %v759_v49  ;;  %v786_v8 = vmul.f32 %v759_v49, %v2251_v61  ;;  %v791_v61 = vld [vmem:[#allocation2 + $0x18] sm:$0xc] }
 0x384   :  { %v730_v60 = vadd.f32 %v1276_v9, %v729_v56 }
 0x386   :  { %v734_v55 = vsel %vm733_vm10, %v1276_v9, %v730_v60 }
 0x387   :  { %v739_v3 = vsel %vm736_vm11, %v738_v1, %v734_v55 }
 0x388   :  { %v781_v4 = vmul.f32 %v779_v11, %v739_v3  ;;  %v914_v3 = vld [vmem:[#allocation2] sm:$0x30] }
 0x38a   :  { %v782_v12 = vadd.f32 %v781_v4, %v677_v0 }
 0x38c   :  { %1277 = vtanh.f32 %v782_v12  ;;  %v915_v12 = vld [vmem:[#allocation2 + $0x18] sm:$0x30] }
 0x392   :  { %v1278_v27 = vpop.eup %1277 }
 0x393   :  { %v785_v42 = vmul.f32 %v1278_v27, %v784_v6 }
 0x395   :  { %v2374_v62 = vadd.f32 %v786_v8, %v785_v42 }
 0x397   :  { %789 = vst.msk [vmem:[#allocation4 + $0x8] sm:$0x3] %vm294_vm9, %v2374_v62  ;;  %809 = vmatmul.f32.vlgmr.msra.gmra.mxu2 %v2374_v62  ;;  %829 = vmatmul.f32.vlgmr.msra.gmra.mxu3 %v2374_v62  ;;  %v908_v57 = vrot.slane %v2374_v62, 6 }
 0x398   :  { %895 = vmatmul.f32.vlgmr.msrb.gmra.mxu0 %v2374_v62  ;;  %1132 = vmatpush.msra.mxu2 %v2043_v13 }
 0x39a   :  { %1133 = vmatpush.msra.mxu2 %v2061_v16 }
 0x39c   :  { %1134 = vmatpush.msra.mxu2 %v2079_v21 }
 0x39e   :  { %1135 = vmatpush.msra.mxu2 %v2097_v24 }
 0x3a0   :  { %1136 = vmatpush.msra.mxu2 %v2271_v5 }
 0x3a2   :  { %1137 = vmatpush.msra.mxu2 %v2279_v58 }
 0x3a4   :  { %1138 = vmatpush.msra.mxu2 %v2287_v15 }
 0x3a6   :  { %1139 = vmatpush.msra.mxu2 %v2295_v17 }
 0x3a8   :  { %1140 = vmatpush.msra.mxu2 %v2303_v18 }
 0x3aa   :  { %1141 = vmatpush.msra.mxu2 %v2311_v22 }
 0x3ac   :  { %1142 = vmatpush.msra.mxu2 %v2319_v23 }
 0x3ae   :  { %1143 = vmatpush.msra.mxu2 %v2327_v25 }
 0x3b0   :  { %1144 = vmatpush.msra.mxu2 %v2335_v26 }
 0x3b2   :  { %1145 = vmatpush.msra.mxu2 %v2343_v28 }
 0x3b4   :  { %1146 = vmatpush.msra.mxu2 %v2353_v34 }
 0x3b6   :  { %1147 = vmatpush.msra.mxu2 %v2363_v37 }
 0x415   :  { %v896_v34 = vpop.f32.mrf.mxu0 }
 0x416   :  { %v897_v43 = vadd.f32 %v2400_v33, %v896_v34 }
 0x418   :  { %v900_v52 = vrot.slane %v897_v43, 6 }
 0x41a   :  { %v810_v13 = vpop.f32.mrf.mxu2  ;;  %v830_v16 = vpop.f32.mrf.mxu3 }
 0x41b   :  { %v834_v21 = vrot.slane %v810_v13, 6  ;;  %v857_v24 = vrot.slane %v830_v16, 6 }
 0x41d   :  { %v836_v5 = vadd.f32 %v834_v21, %v790_v10  ;;  %v859_v58 = vadd.f32 %v857_v24, %v791_v61 }
 0x41f   :  { %v1218_v15 = vmul.f32 -1.442695, %v836_v5  ;;  %v1219_v17 = vmul.f32 -1.442695, %v859_v58 }
 0x421   :  { %1279 = vpow2.f32 %v1218_v15 }
 0x422   :  { %1281 = vpow2.f32 %v1219_v17 }
 0x427   :  { %v1280_v18 = vpop.eup %1279 }
 0x428   :  { %v1282_v22 = vpop.eup %1281  ;;  %v840_v23 = vadd.f32 1.0, %v1280_v18 }
 0x429   :  { %v863_v25 = vadd.f32 1.0, %v1282_v22 }
 0x42a   :  { %1283 = vrcp.f32 %v840_v23  ;;  %v852_v32 = vand.u32 2147483648, %v840_v23  ;;  %v850_v46 = vand.u32 2147483647, %v840_v23  ;;  %vm846_vm1 = vweird.f32 %v840_v23 }
 0x42b   :  { %1285 = vrcp.f32 %v863_v25  ;;  %v875_v41 = vand.u32 2147483648, %v863_v25  ;;  %vm869_vm7 = vweird.f32 %v863_v25  ;;  %v873_v9 = vand.u32 2147483647, %v863_v25 }
 0x42c   :  { %v853_v38 = vor.u32 1.1754944e-38, %v852_v32  ;;  %vm851_vm4 = vcmp.eq.f32.partialorder %v850_v46, 8.507059e+37 }
 0x42d   :  { %v876_v48 = vor.u32 1.1754944e-38, %v875_v41  ;;  %vm874_vm10 = vcmp.eq.f32.partialorder %v873_v9, 8.507059e+37  ;;  %v1040_v9 = vld [vmem:[#allocation2] sm:$0xc0] }
 0x430   :  { %v1284_v26 = vpop.eup %1283 }
 0x431   :  { %v1286_v28 = vpop.eup %1285  ;;  %v842_v30 = vmul.f32 %v1284_v26, %v840_v23  ;;  %vm847_vm9 = vweird.f32 %v1284_v26 }
 0x432   :  { %v865_v31 = vmul.f32 %v1286_v28, %v863_v25  ;;  %vm848_vm3 = vmor %vm846_vm1, %vm847_vm9  ;;  %vm870_vm5 = vweird.f32 %v1286_v28 }
 0x433   :  { %v843_v37 = vsub.f32 1.0, %v842_v30  ;;  %vm871_vm8 = vmor %vm869_vm7, %vm870_vm5 }
 0x434   :  { %v866_v40 = vsub.f32 1.0, %v865_v31  ;;  %v916_v31 = vld [vmem:[#allocation2 + $0x20] sm:$0x30] }
 0x435   :  { %v844_v35 = vmul.f32 %v1284_v26, %v843_v37 }
 0x436   :  { %v867_v36 = vmul.f32 %v1286_v28, %v866_v40 }
 0x437   :  { %v845_v50 = vadd.f32 %v1284_v26, %v844_v35 }
 0x438   :  { %v868_v20 = vadd.f32 %v1286_v28, %v867_v36 }
 0x439   :  { %v849_v39 = vsel %vm848_vm3, %v1284_v26, %v845_v50 }
 0x43a   :  { %v854_v53 = vsel %vm851_vm4, %v853_v38, %v849_v39  ;;  %v872_v63 = vsel %vm871_vm8, %v1286_v28, %v868_v20 }
 0x43b   :  { %v902_v54 = vmul.f32 %v900_v52, %v854_v53  ;;  %v877_v29 = vsel %vm874_vm10, %v876_v48, %v872_v63 }
 0x43c   :  { %v905_v56 = vsub.f32 1.0, %v877_v29  ;;  %v910_v60 = vmul.f32 %v908_v57, %v877_v29 }
 0x43d   :  { %v903_v59 = vadd.f32 %v902_v54, %v792_v7 }
 0x43f   :  { %1287 = vtanh.f32 %v903_v59  ;;  %v1041_v59 = vld [vmem:[#allocation2 + $0x18] sm:$0xc0] }
 0x445   :  { %v1288_v19 = vpop.eup %1287 }
 0x446   :  { %v906_v2 = vmul.f32 %v1288_v19, %v905_v56 }
 0x448   :  { %v2404_v1 = vadd.f32 %v910_v60, %v906_v2 }
 0x44a   :  { %913 = vst.msk [vmem:[#allocation4 + $0x8] sm:$0xc] %vm419_vm2, %v2404_v1  ;;  %v918_v11 = vrot.slane %v2404_v1, 2  ;;  %v1034_v36 = vrot.slane %v2404_v1, 6 }
 0x44c   :  { %936 = vmatmul.f32.vlgmr.msrb.gmra.mxu1 %v918_v11  ;;  %956 = vmatmul.f32.vlgmr.msrb.gmra.mxu2 %v918_v11 }
 0x44d   :  { %1022 = vmatmul.f32.vlgmr.msrb.gmra.mxu3 %v918_v11 }
 0x4c9   :  { %v937_v55 = vpop.f32.mrf.mxu1 }
 0x4ca   :  { %v961_v44 = vrot.slane %v937_v55, 4 }
 0x4cc   :  { %v963_v45 = vadd.f32 %v961_v44, %v914_v3 }
 0x4ce   :  { %v1220_v4 = vmul.f32 -1.442695, %v963_v45 }
 0x4cf   :  { %v957_v47 = vpop.f32.mrf.mxu2 }
 0x4d0   :  { %1289 = vpow2.f32 %v1220_v4  ;;  %v984_v0 = vrot.slane %v957_v47, 4  ;;  %v1023_v13 = vpop.f32.mrf.mxu3 }
 0x4d1   :  { %v1024_v61 = vadd.f32 %v2400_v33, %v1023_v13 }
 0x4d2   :  { %v986_v14 = vadd.f32 %v984_v0, %v915_v12 }
 0x4d3   :  { %v1027_v23 = vrot.slane %v1024_v61, 4 }
 0x4d4   :  { %v1221_v51 = vmul.f32 -1.442695, %v986_v14 }
 0x4d6   :  { %v1290_v49 = vpop.eup %1289  ;;  %1291 = vpow2.f32 %v1221_v51 }
 0x4d7   :  { %v967_v6 = vadd.f32 1.0, %v1290_v49 }
 0x4d9   :  { %1293 = vrcp.f32 %v967_v6  ;;  %v979_v21 = vand.u32 2147483648, %v967_v6  ;;  %v977_v10 = vand.u32 2147483647, %v967_v6  ;;  %vm973_vm11 = vweird.f32 %v967_v6 }
 0x4db   :  { %v980_v17 = vor.u32 1.1754944e-38, %v979_v21  ;;  %vm978_vm14 = vcmp.eq.f32.partialorder %v977_v10, 8.507059e+37 }
 0x4dc   :  { %v1292_v27 = vpop.eup %1291 }
 0x4dd   :  { %v990_v42 = vadd.f32 1.0, %v1292_v27 }
 0x4df   :  { %v1294_v8 = vpop.eup %1293  ;;  %1295 = vrcp.f32 %v990_v42  ;;  %v1002_v28 = vand.u32 2147483648, %v990_v42  ;;  %v1000_v34 = vand.u32 2147483647, %v990_v42  ;;  %vm996_vm0 = vweird.f32 %v990_v42 }
 0x4e0   :  { %v969_v62 = vmul.f32 %v1294_v8, %v967_v6  ;;  %vm974_vm2 = vweird.f32 %v1294_v8 }
 0x4e1   :  { %vm975_vm13 = vmor %vm973_vm11, %vm974_vm2  ;;  %v1003_v40 = vor.u32 1.1754944e-38, %v1002_v28  ;;  %vm1001_vm1 = vcmp.eq.f32.partialorder %v1000_v34, 8.507059e+37 }
 0x4e2   :  { %v970_v16 = vsub.f32 1.0, %v969_v62 }
 0x4e4   :  { %v971_v24 = vmul.f32 %v1294_v8, %v970_v16 }
 0x4e5   :  { %v1296_v5 = vpop.eup %1295 }
 0x4e6   :  { %v992_v58 = vmul.f32 %v1296_v5, %v990_v42  ;;  %v972_v15 = vadd.f32 %v1294_v8, %v971_v24  ;;  %vm997_vm15 = vweird.f32 %v1296_v5  ;;  %v1042_v24 = vld [vmem:[#allocation2 + $0x20] sm:$0xc0] }
 0x4e7   :  { %vm998_vm9 = vmor %vm996_vm0, %vm997_vm15 }
 0x4e8   :  { %v993_v18 = vsub.f32 1.0, %v992_v58  ;;  %v976_v22 = vsel %vm975_vm13, %v1294_v8, %v972_v15 }
 0x4e9   :  { %v981_v25 = vsel %vm978_vm14, %v980_v17, %v976_v22 }
 0x4ea   :  { %v994_v26 = vmul.f32 %v1296_v5, %v993_v18  ;;  %v1029_v30 = vmul.f32 %v1027_v23, %v981_v25 }
 0x4ec   :  { %v995_v37 = vadd.f32 %v1296_v5, %v994_v26  ;;  %v1030_v32 = vadd.f32 %v1029_v30, %v916_v31 }
 0x4ee   :  { %v999_v43 = vsel %vm998_vm9, %v1296_v5, %v995_v37  ;;  %1297 = vtanh.f32 %v1030_v32 }
 0x4ef   :  { %v1004_v35 = vsel %vm1001_vm1, %v1003_v40, %v999_v43 }
 0x4f0   :  { %v1032_v46 = vsub.f32 1.0, %v1004_v35  ;;  %v1036_v52 = vmul.f32 %v1034_v36, %v1004_v35 }
 0x4f4   :  { %v1298_v50 = vpop.eup %1297 }
 0x4f5   :  { %v1033_v38 = vmul.f32 %v1298_v50, %v1032_v46 }
 0x4f7   :  { %v2411_v39 = vadd.f32 %v1036_v52, %v1033_v38 }
 0x4f9   :  { %1039 = vst.msk [vmem:[#allocation4 + $0x8] sm:$0x30] %vm546_vm12, %v2411_v39  ;;  %v1044_v53 = vrot.slane %v2411_v39, 4  ;;  %v1160_v58 = vrot.slane %v2411_v39, 6 }
 0x4fb   :  { %1062 = vmatmul.f32.vlgmr.msra.gmra.mxu0 %v1044_v53  ;;  %1082 = vmatmul.f32.vlgmr.msra.gmra.mxu1 %v1044_v53 }
 0x4fc   :  { %1148 = vmatmul.f32.vlgmr.msra.gmra.mxu2 %v1044_v53 }
 0x578   :  { %v1063_v20 = vpop.f32.mrf.mxu0  ;;  %v1083_v54 = vpop.f32.mrf.mxu1 }
 0x579   :  { %v1087_v41 = vrot.slane %v1063_v20, 2  ;;  %v1110_v7 = vrot.slane %v1083_v54, 2 }
 0x57b   :  { %v1089_v63 = vadd.f32 %v1087_v41, %v1040_v9  ;;  %v1112_v48 = vadd.f32 %v1110_v7, %v1041_v59 }
 0x57d   :  { %v1222_v29 = vmul.f32 -1.442695, %v1089_v63  ;;  %v1223_v56 = vmul.f32 -1.442695, %v1112_v48 }
 0x57f   :  { %1299 = vpow2.f32 %v1222_v29  ;;  %v1149_v3 = vpop.f32.mrf.mxu2 }
 0x580   :  { %1301 = vpow2.f32 %v1223_v56  ;;  %v1150_v14 = vadd.f32 %v2400_v33, %v1149_v3 }
 0x582   :  { %v1153_v42 = vrot.slane %v1150_v14, 2 }
 0x585   :  { %v1300_v57 = vpop.eup %1299 }
 0x586   :  { %v1302_v19 = vpop.eup %1301  ;;  %v1093_v2 = vadd.f32 1.0, %v1300_v57 }
 0x587   :  { %v1116_v60 = vadd.f32 1.0, %v1302_v19 }
 0x588   :  { %1303 = vrcp.f32 %v1093_v2  ;;  %v1105_v47 = vand.u32 2147483648, %v1093_v2  ;;  %v1103_v12 = vand.u32 2147483647, %v1093_v2  ;;  %vm1099_vm3 = vweird.f32 %v1093_v2 }
 0x589   :  { %1305 = vrcp.f32 %v1116_v60  ;;  %v1128_v13 = vand.u32 2147483648, %v1116_v60  ;;  %vm1122_vm8 = vweird.f32 %v1116_v60  ;;  %v1126_v21 = vand.u32 2147483647, %v1116_v60 }
 0x58a   :  { %v1106_v6 = vor.u32 1.1754944e-38, %v1105_v47  ;;  %vm1104_vm5 = vcmp.eq.f32.partialorder %v1103_v12, 8.507059e+37 }
 0x58b   :  { %v1129_v33 = vor.u32 1.1754944e-38, %v1128_v13  ;;  %vm1127_vm2 = vcmp.eq.f32.partialorder %v1126_v21, 8.507059e+37 }
 0x58e   :  { %v1304_v1 = vpop.eup %1303 }
 0x58f   :  { %v1306_v11 = vpop.eup %1305  ;;  %v1095_v55 = vmul.f32 %v1304_v1, %v1093_v2  ;;  %vm1100_vm12 = vweird.f32 %v1304_v1 }
 0x590   :  { %v1118_v44 = vmul.f32 %v1306_v11, %v1116_v60  ;;  %vm1101_vm4 = vmor %vm1099_vm3, %vm1100_vm12  ;;  %vm1123_vm7 = vweird.f32 %v1306_v11 }
 0x591   :  { %v1096_v45 = vsub.f32 1.0, %v1095_v55  ;;  %vm1124_vm10 = vmor %vm1122_vm8, %vm1123_vm7 }
 0x592   :  { %v1119_v4 = vsub.f32 1.0, %v1118_v44 }
 0x593   :  { %v1097_v0 = vmul.f32 %v1304_v1, %v1096_v45 }
 0x594   :  { %v1120_v51 = vmul.f32 %v1306_v11, %v1119_v4 }
 0x595   :  { %v1098_v49 = vadd.f32 %v1304_v1, %v1097_v0 }
 0x596   :  { %v1121_v8 = vadd.f32 %v1306_v11, %v1120_v51 }
 0x597   :  { %v1102_v27 = vsel %vm1101_vm4, %v1304_v1, %v1098_v49 }
 0x598   :  { %v1107_v62 = vsel %vm1104_vm5, %v1106_v6, %v1102_v27  ;;  %v1125_v61 = vsel %vm1124_vm10, %v1306_v11, %v1121_v8 }
 0x599   :  { %v1155_v16 = vmul.f32 %v1153_v42, %v1107_v62  ;;  %v1130_v5 = vsel %vm1127_vm2, %v1129_v33, %v1125_v61 }
 0x59a   :  { %v1158_v15 = vsub.f32 1.0, %v1130_v5  ;;  %v1162_v22 = vmul.f32 %v1160_v58, %v1130_v5 }
 0x59b   :  { %v1156_v10 = vadd.f32 %v1155_v16, %v1042_v24 }
 0x59d   :  { %1307 = vtanh.f32 %v1156_v10 }
 0x5a3   :  { %v1308_v17 = vpop.eup %1307 }
 0x5a4   :  { %v1159_v18 = vmul.f32 %v1308_v17, %v1158_v15 }
 0x5a6   :  { %v1163_v23 = vadd.f32 %v1162_v22, %v1159_v18 }
 0x5a8   :  { %1165 = vst.msk [vmem:[#allocation4 + $0x8] sm:$0xc0] %vm673_vm6, %v1163_v23 }
 0x5a9   :  { %1166 = vst [vmem:[#allocation3 - $0x6] sm:$0xc0] %v1163_v23  ;;  %1180 = dma.vmem_to_hbm [thread:$0]  %s1173_s8, 256, %s1175_s11, [#allocation5], %s1412_s6, %s1412_s6, %s1413_s4  }
 0x5aa   :  { %1167 = vst.msk [vmem:[#allocation6 - $0x6] sm:$0xc0] %vm673_vm6, %v1163_v23 }
 0x5ab   :  { %1191 = dma.vmem_to_hbm [thread:$0]  %s1187_s13, 32, %s1189_s16, [#allocation7]  }
 0x5ac   :  { %1406 = dma.done.wait [#allocation5], 256  }
 0x5ad   :  { %1407 = vsyncadd [#allocation5], 4294967040 }
 0x5ae   :  { %1408 = dma.done.wait [#allocation7], 32  }
 0x5af   :  { %1409 = vsyncadd [#allocation7], 4294967264 }
 0x5b0   :  { %1200 = vsyncpa [#allocation5], 1 }
 0x5b1   :  { %1201 = vsyncpa [#allocation7], 1 }

</bundles_post_ra>
